<compile_context>
chip_gen: v7x
topology: tpu7x:2x2x1
jax: 0.10.0
libtpu: 0.0.40
codegen_flags: <defaults>
</compile_context>

<pallas_src>
import jax
import jax.numpy as jnp
import numpy as np
from jax.experimental import pallas as pl
from jax.experimental.pallas import tpu as pltpu

# Scaled-down versions of the module constants (block_size=256, n_embd=384,
# vocab_size=len(chars)) so the example stays small.
VOCAB_SIZE = 65
VOCAB_PAD = 128                       # lane-dense logits (pad 65 -> 128, slice after)
BLOCK_SIZE = 16                       # max context length (position table rows)
N_EMBD = 32
NUM_HEADS = 4
HEAD_SIZE = N_EMBD // NUM_HEADS       # 8
QKV_DIM = 3 * NUM_HEADS * HEAD_SIZE   # 96


def _bigram_kernel(x_ref, wqkv_ref, wp_ref, bp_ref, wl_ref, bl_ref, out_ref):
    Bt, T, C = x_ref.shape
    x2 = x_ref[...].reshape(Bt * T, C)                       # (Bt*T, C)

    # One fused QKV projection instead of 3*NUM_HEADS tiny dots.
    qkv = jnp.dot(x2, wqkv_ref[...], preferred_element_type=jnp.float32)  # (Bt*T, 96)

    # Causal (lower-triangular) mask, built with 2-D iota (TPU requirement).
    row = jax.lax.broadcasted_iota(jnp.int32, (T, T), 0)
    col = jax.lax.broadcasted_iota(jnp.int32, (T, T), 1)
    causal = (row >= col)[None]                              # (1, T, T), bcast over Bt

    HD = NUM_HEADS * HEAD_SIZE
    # Reproduces the PyTorch module exactly: scale = k.shape[-1] * -0.5
    # (i.e. head_size * -0.5, NOT head_size ** -0.5).  Folded into q once.
    scale = jnp.float32(HEAD_SIZE * -0.5)

    head_outs = []
    for h in range(NUM_HEADS):                               # static unroll, 4 heads
        q = qkv[:, h * HEAD_SIZE:(h + 1) * HEAD_SIZE].reshape(Bt, T, HEAD_SIZE) * scale
        k = qkv[:, HD + h * HEAD_SIZE:HD + (h + 1) * HEAD_SIZE].reshape(
            Bt, T, HEAD_SIZE)
        v = qkv[:, 2 * HD + h * HEAD_SIZE:2 * HD + (h + 1) * HEAD_SIZE].reshape(
            Bt, T, HEAD_SIZE)

        s = jnp.einsum("bqd,bkd->bqk", q, k, preferred_element_type=jnp.float32)
        s = jnp.where(causal, s, jnp.float32(-1e30))         # large-finite mask value
        m = jnp.max(s, axis=-1, keepdims=True)
        e = jnp.exp(s - m)
        denom = jnp.sum(e, axis=-1, keepdims=True)
        p = e * pl.reciprocal(denom, approx=True)            # EUP vrcp, off the VALU
        # nn.Dropout is identity at inference time.
        head_outs.append(
            jnp.einsum("bqk,bkd->bqd", p, v, preferred_element_type=jnp.float32))

    cat = jnp.concatenate(head_outs, axis=-1).reshape(Bt * T, C)   # (Bt*T, C)
    sa = jnp.dot(cat, wp_ref[...], preferred_element_type=jnp.float32) + bp_ref[...]
    logits = jnp.dot(sa, wl_ref[...], preferred_element_type=jnp.float32) + bl_ref[...]
    out_ref[...] = logits.reshape(Bt, T, VOCAB_PAD)


def init_params(key):
    ks = jax.random.split(key, 9)
    s = 0.02
    return {
        "tok_table": jax.random.normal(ks[0], (VOCAB_SIZE, N_EMBD), jnp.float32) * s,
        "pos_table": jax.random.normal(ks[1], (BLOCK_SIZE, N_EMBD), jnp.float32) * s,
        "wq": jax.random.normal(ks[2], (NUM_HEADS, N_EMBD, HEAD_SIZE), jnp.float32) * s,
        "wk": jax.random.normal(ks[3], (NUM_HEADS, N_EMBD, HEAD_SIZE), jnp.float32) * s,
        "wv": jax.random.normal(ks[4], (NUM_HEADS, N_EMBD, HEAD_SIZE), jnp.float32) * s,
        "wp": jax.random.normal(ks[5], (N_EMBD, N_EMBD), jnp.float32) * s,
        "bp": jax.random.normal(ks[6], (1, N_EMBD), jnp.float32) * s,
        "wl": jax.random.normal(ks[7], (N_EMBD, VOCAB_SIZE), jnp.float32) * s,
        "bl": jax.random.normal(ks[8], (1, VOCAB_SIZE), jnp.float32) * s,
    }


def bigram_forward(idx, params, targets=None, batch_tile=None):
    """Mirrors the PyTorch forward: returns (logits, loss)."""
    B, T = idx.shape

    # Plain-JAX glue: embedding gathers + add (identical to tok_emb + pos_emb).
    # TODO(synk): could be fused in-kernel via a pl.Element row-gather BlockSpec
    # to avoid the (B, T, C) HBM round-trip.
    tok_emb = jnp.take(params["tok_table"], idx, axis=0)     # (B, T, C)
    pos_emb = params["pos_table"][:T]                         # (T, C)
    x = (tok_emb + pos_emb).astype(jnp.float32)               # (B, T, C)

    # Fused QKV weight: columns = [q_h0..q_h3 | k_h0..k_h3 | v_h0..v_h3].
    def stack(w):  # (H, C, D) -> (C, H*D)
        return jnp.transpose(w, (1, 0, 2)).reshape(N_EMBD, NUM_HEADS * HEAD_SIZE)
    wqkv = jnp.concatenate(
        [stack(params["wq"]), stack(params["wk"]), stack(params["wv"])], axis=1)

    # Lane-dense lm_head: pad vocab 65 -> 128 (zeros), slice logits afterwards.
    wl = jnp.pad(params["wl"], ((0, 0), (0, VOCAB_PAD - VOCAB_SIZE)))
    bl = jnp.pad(params["bl"], ((0, 0), (0, VOCAB_PAD - VOCAB_SIZE)))

    # Fold several batch elements per grid step; keep >= 2 parallel steps so
    # both v7x TensorCores / megacore halves get work.
    if batch_tile is None:
        batch_tile = B // 2 if (B % 2 == 0 and B >= 2) else B
    assert B % batch_tile == 0
    grid = (B // batch_tile,)

    logits_pad = pl.pallas_call(
        _bigram_kernel,
        out_shape=jax.ShapeDtypeStruct((B, T, VOCAB_PAD), jnp.float32),
        grid_spec=pltpu.PrefetchScalarGridSpec(
            num_scalar_prefetch=0,
            grid=grid,
            in_specs=[
                pl.BlockSpec((batch_tile, T, N_EMBD), lambda b: (b, 0, 0)),
                pl.BlockSpec((N_EMBD, QKV_DIM), lambda b: (0, 0)),
                pl.BlockSpec((N_EMBD, N_EMBD), lambda b: (0, 0)),
                pl.BlockSpec((1, N_EMBD), lambda b: (0, 0)),
                pl.BlockSpec((N_EMBD, VOCAB_PAD), lambda b: (0, 0)),
                pl.BlockSpec((1, VOCAB_PAD), lambda b: (0, 0)),
            ],
            out_specs=pl.BlockSpec((batch_tile, T, VOCAB_PAD), lambda b: (b, 0, 0)),
        ),
        compiler_params=pltpu.CompilerParams(dimension_semantics=("parallel",)),
    )(x, wqkv, params["wp"], params["bp"], wl, bl)

    logits = logits_pad[:, :, :VOCAB_SIZE]

    if targets is None:
        return logits, None

    # TODO(synk): loss computed in plain JAX (not in-kernel), matching
    # F.cross_entropy on flattened (B*T, C) logits like the PyTorch forward.
    flat = logits.reshape(B * T, VOCAB_SIZE)
    tflat = targets.reshape(B * T)
    logz = jax.nn.logsumexp(flat, axis=-1)
    loss = jnp.mean(logz - jnp.take_along_axis(flat, tflat[:, None], axis=-1)[:, 0])
    return flat, loss


def _reference_forward(idx, params):
    """Pure-JAX reference mirroring the PyTorch semantics, for verification."""
    B, T = idx.shape
    x = jnp.take(params["tok_table"], idx, axis=0) + params["pos_table"][:T]
    causal = jnp.tril(jnp.ones((T, T), bool))
    outs = []
    for h in range(NUM_HEADS):
        q = x @ params["wq"][h]
        k = x @ params["wk"][h]
        v = x @ params["wv"][h]
        wei = jnp.einsum("btd,bsd->bts", q, k) * (HEAD_SIZE * -0.5)
        wei = jnp.where(causal[None], wei, -jnp.inf)
        wei = jax.nn.softmax(wei, axis=-1)
        outs.append(jnp.einsum("bts,bsd->btd", wei, v))
    cat = jnp.concatenate(outs, axis=-1)
    sa = cat @ params["wp"] + params["bp"][0]
    return sa @ params["wl"] + params["bl"][0]


if __name__ == "__main__":
    key = jax.random.PRNGKey(0)
    pkey, ikey = jax.random.split(key)
    params = init_params(pkey)

    B, T = 8, BLOCK_SIZE   # 8 sequences of length 16 -> grid of 2 parallel steps
    idx = jax.random.randint(ikey, (B, T), 0, VOCAB_SIZE, dtype=jnp.int32)

    logits, loss = bigram_forward(idx, params)
    logits = jax.block_until_ready(logits)

    ref = jax.block_until_ready(_reference_forward(idx, params))
    # Slightly relaxed tolerance: approx reciprocal in the softmax normalization.
    np.testing.assert_allclose(np.asarray(logits), np.asarray(ref),
                               rtol=2e-3, atol=1e-5)
    assert logits.shape == (B, T, VOCAB_SIZE) and loss is None
    print("KERNEL_OK")
</pallas_src>

<mosaic_0001>
module attributes {stable_mosaic.version = 11 : i64} {
  func.func @_bigram_kernel(%arg0: i32, %arg1: memref<4x16x32xf32, #tpu.memory_space<vmem>>, %arg2: memref<32x96xf32, #tpu.memory_space<vmem>>, %arg3: memref<32x32xf32, #tpu.memory_space<vmem>>, %arg4: memref<1x32xf32, #tpu.memory_space<vmem>>, %arg5: memref<32x128xf32, #tpu.memory_space<vmem>>, %arg6: memref<1x128xf32, #tpu.memory_space<vmem>>, %arg7: memref<4x16x128xf32, #tpu.memory_space<vmem>>) attributes {dimension_semantics = [#tpu.dimension_semantics<parallel>], iteration_bounds = array<i64: 2>, scalar_prefetch = 0 : i64, scratch_operands = 0 : i64, tpu.core_type = #tpu.core_type<tc>, window_params = [{transform_indices = @transform_0, window_bounds = array<i64: 4, 16, 32>}, {pipeline_mode = #tpu.pipeline_mode<synchronous>, transform_indices = @transform_1, window_bounds = array<i64: 32, 96>}, {pipeline_mode = #tpu.pipeline_mode<synchronous>, transform_indices = @transform_2, window_bounds = array<i64: 32, 32>}, {pipeline_mode = #tpu.pipeline_mode<synchronous>, transform_indices = @transform_3, window_bounds = array<i64: 1, 32>}, {pipeline_mode = #tpu.pipeline_mode<synchronous>, transform_indices = @transform_4, window_bounds = array<i64: 32, 128>}, {pipeline_mode = #tpu.pipeline_mode<synchronous>, transform_indices = @transform_5, window_bounds = array<i64: 1, 128>}, {transform_indices = @transform_6, window_bounds = array<i64: 4, 16, 128>}]} {
    %c0 = arith.constant 0 : index
    %c0_0 = arith.constant 0 : index
    %c0_1 = arith.constant 0 : index
    %0 = vector.load %arg1[%c0, %c0_0, %c0_1] : memref<4x16x32xf32, #tpu.memory_space<vmem>>, vector<4x16x32xf32>
    %1 = vector.shape_cast %0 : vector<4x16x32xf32> to vector<64x32xf32>
    %c0_2 = arith.constant 0 : index
    %c0_3 = arith.constant 0 : index
    %2 = vector.load %arg2[%c0_2, %c0_3] : memref<32x96xf32, #tpu.memory_space<vmem>>, vector<32x96xf32>
    %cst = arith.constant dense<0.000000e+00> : vector<64x96xf32>
    %3 = tpu.matmul %1, %2, %cst {dimension_numbers = #tpu.dot_dimension_numbers<[1], [0], [0], [1], [0, 0, 1, 1], [], []>} : vector<64x32xf32>, vector<32x96xf32>, vector<64x96xf32> -> vector<64x96xf32>
    %4 = tpu.iota {dimensions = array<i32: 0>} : vector<16x16xi32>
    %5 = tpu.iota {dimensions = array<i32: 1>} : vector<16x16xi32>
    %6 = arith.cmpi sge, %4, %5 : vector<16x16xi32>
    %7 = vector.shape_cast %6 : vector<16x16xi1> to vector<1x16x16xi1>
    %8 = vector.extract_strided_slice %3 {offsets = [0, 0], sizes = [64, 8], strides = [1, 1]} : vector<64x96xf32> to vector<64x8xf32>
    %9 = vector.shape_cast %8 : vector<64x8xf32> to vector<4x16x8xf32>
    %cst_4 = arith.constant -4.000000e+00 : f32
    %10 = vector.broadcast %cst_4 : f32 to vector<4x16x8xf32>
    %11 = arith.mulf %9, %10 : vector<4x16x8xf32>
    %12 = vector.extract_strided_slice %3 {offsets = [0, 32], sizes = [64, 8], strides = [1, 1]} : vector<64x96xf32> to vector<64x8xf32>
    %13 = vector.shape_cast %12 : vector<64x8xf32> to vector<4x16x8xf32>
    %14 = vector.extract_strided_slice %3 {offsets = [0, 64], sizes = [64, 8], strides = [1, 1]} : vector<64x96xf32> to vector<64x8xf32>
    %15 = vector.shape_cast %14 : vector<64x8xf32> to vector<4x16x8xf32>
    "tpu.trace_start"() <{level = 10 : i32, message = "bqd,bkd->bqk"}> : () -> ()
    %cst_5 = arith.constant dense<0.000000e+00> : vector<4x16x16xf32>
    %16 = tpu.matmul %11, %13, %cst_5 {dimension_numbers = #tpu.dot_dimension_numbers<[2], [2], [1], [1], [0, 0, 0, 1, 1, 1], [0], [0]>} : vector<4x16x8xf32>, vector<4x16x8xf32>, vector<4x16x16xf32> -> vector<4x16x16xf32>
    %cst_6 = arith.constant -1.000000e+30 : f32
    "tpu.trace_stop"() : () -> ()
    %17 = vector.shape_cast %7 : vector<1x16x16xi1> to vector<1x16x16xi1>
    %18 = vector.broadcast %17 : vector<1x16x16xi1> to vector<4x16x16xi1>
    %19 = vector.broadcast %cst_6 : f32 to vector<4x16x16xf32>
    %20 = arith.select %18, %16, %19 : vector<4x16x16xi1>, vector<4x16x16xf32>
    %cst_7 = arith.constant dense<0xFF800000> : vector<4x16xf32>
    %21 = vector.multi_reduction <maximumf>, %20, %cst_7 [2] : vector<4x16x16xf32> to vector<4x16xf32>
    %22 = vector.shape_cast %21 : vector<4x16xf32> to vector<4x16x1xf32>
    %23 = vector.broadcast %22 : vector<4x16x1xf32> to vector<4x16x16xf32>
    %24 = arith.subf %20, %23 : vector<4x16x16xf32>
    %25 = math.exp %24 : vector<4x16x16xf32>
    %cst_8 = arith.constant dense<0.000000e+00> : vector<4x16xf32>
    %26 = vector.multi_reduction <add>, %25, %cst_8 [2] : vector<4x16x16xf32> to vector<4x16xf32>
    %27 = vector.shape_cast %26 : vector<4x16xf32> to vector<4x16x1xf32>
    %28 = tpu.reciprocal %27 {approx = true} : vector<4x16x1xf32> -> vector<4x16x1xf32>
    %29 = vector.broadcast %28 : vector<4x16x1xf32> to vector<4x16x16xf32>
    %30 = arith.mulf %25, %29 : vector<4x16x16xf32>
    "tpu.trace_start"() <{level = 10 : i32, message = "bqk,bkd->bqd"}> : () -> ()
    %cst_9 = arith.constant dense<0.000000e+00> : vector<4x16x8xf32>
    %31 = tpu.matmul %30, %15, %cst_9 {dimension_numbers = #tpu.dot_dimension_numbers<[2], [1], [1], [2], [0, 0, 0, 1, 1, 2], [0], [0]>} : vector<4x16x16xf32>, vector<4x16x8xf32>, vector<4x16x8xf32> -> vector<4x16x8xf32>
    "tpu.trace_stop"() : () -> ()
    %32 = vector.extract_strided_slice %3 {offsets = [0, 8], sizes = [64, 8], strides = [1, 1]} : vector<64x96xf32> to vector<64x8xf32>
    %33 = vector.shape_cast %32 : vector<64x8xf32> to vector<4x16x8xf32>
    %cst_10 = arith.constant -4.000000e+00 : f32
    %34 = vector.broadcast %cst_10 : f32 to vector<4x16x8xf32>
    %35 = arith.mulf %33, %34 : vector<4x16x8xf32>
    %36 = vector.extract_strided_slice %3 {offsets = [0, 40], sizes = [64, 8], strides = [1, 1]} : vector<64x96xf32> to vector<64x8xf32>
    %37 = vector.shape_cast %36 : vector<64x8xf32> to vector<4x16x8xf32>
    %38 = vector.extract_strided_slice %3 {offsets = [0, 72], sizes = [64, 8], strides = [1, 1]} : vector<64x96xf32> to vector<64x8xf32>
    %39 = vector.shape_cast %38 : vector<64x8xf32> to vector<4x16x8xf32>
    "tpu.trace_start"() <{level = 10 : i32, message = "bqd,bkd->bqk"}> : () -> ()
    %cst_11 = arith.constant dense<0.000000e+00> : vector<4x16x16xf32>
    %40 = tpu.matmul %35, %37, %cst_11 {dimension_numbers = #tpu.dot_dimension_numbers<[2], [2], [1], [1], [0, 0, 0, 1, 1, 1], [0], [0]>} : vector<4x16x8xf32>, vector<4x16x8xf32>, vector<4x16x16xf32> -> vector<4x16x16xf32>
    %cst_12 = arith.constant -1.000000e+30 : f32
    "tpu.trace_stop"() : () -> ()
    %41 = vector.shape_cast %7 : vector<1x16x16xi1> to vector<1x16x16xi1>
    %42 = vector.broadcast %41 : vector<1x16x16xi1> to vector<4x16x16xi1>
    %43 = vector.broadcast %cst_12 : f32 to vector<4x16x16xf32>
    %44 = arith.select %42, %40, %43 : vector<4x16x16xi1>, vector<4x16x16xf32>
    %cst_13 = arith.constant dense<0xFF800000> : vector<4x16xf32>
    %45 = vector.multi_reduction <maximumf>, %44, %cst_13 [2] : vector<4x16x16xf32> to vector<4x16xf32>
    %46 = vector.shape_cast %45 : vector<4x16xf32> to vector<4x16x1xf32>
    %47 = vector.broadcast %46 : vector<4x16x1xf32> to vector<4x16x16xf32>
    %48 = arith.subf %44, %47 : vector<4x16x16xf32>
    %49 = math.exp %48 : vector<4x16x16xf32>
    %cst_14 = arith.constant dense<0.000000e+00> : vector<4x16xf32>
    %50 = vector.multi_reduction <add>, %49, %cst_14 [2] : vector<4x16x16xf32> to vector<4x16xf32>
    %51 = vector.shape_cast %50 : vector<4x16xf32> to vector<4x16x1xf32>
    %52 = tpu.reciprocal %51 {approx = true} : vector<4x16x1xf32> -> vector<4x16x1xf32>
    %53 = vector.broadcast %52 : vector<4x16x1xf32> to vector<4x16x16xf32>
    %54 = arith.mulf %49, %53 : vector<4x16x16xf32>
    "tpu.trace_start"() <{level = 10 : i32, message = "bqk,bkd->bqd"}> : () -> ()
    %cst_15 = arith.constant dense<0.000000e+00> : vector<4x16x8xf32>
    %55 = tpu.matmul %54, %39, %cst_15 {dimension_numbers = #tpu.dot_dimension_numbers<[2], [1], [1], [2], [0, 0, 0, 1, 1, 2], [0], [0]>} : vector<4x16x16xf32>, vector<4x16x8xf32>, vector<4x16x8xf32> -> vector<4x16x8xf32>
    "tpu.trace_stop"() : () -> ()
    %56 = vector.extract_strided_slice %3 {offsets = [0, 16], sizes = [64, 8], strides = [1, 1]} : vector<64x96xf32> to vector<64x8xf32>
    %57 = vector.shape_cast %56 : vector<64x8xf32> to vector<4x16x8xf32>
    %cst_16 = arith.constant -4.000000e+00 : f32
    %58 = vector.broadcast %cst_16 : f32 to vector<4x16x8xf32>
    %59 = arith.mulf %57, %58 : vector<4x16x8xf32>
    %60 = vector.extract_strided_slice %3 {offsets = [0, 48], sizes = [64, 8], strides = [1, 1]} : vector<64x96xf32> to vector<64x8xf32>
    %61 = vector.shape_cast %60 : vector<64x8xf32> to vector<4x16x8xf32>
    %62 = vector.extract_strided_slice %3 {offsets = [0, 80], sizes = [64, 8], strides = [1, 1]} : vector<64x96xf32> to vector<64x8xf32>
    %63 = vector.shape_cast %62 : vector<64x8xf32> to vector<4x16x8xf32>
    "tpu.trace_start"() <{level = 10 : i32, message = "bqd,bkd->bqk"}> : () -> ()
    %cst_17 = arith.constant dense<0.000000e+00> : vector<4x16x16xf32>
    %64 = tpu.matmul %59, %61, %cst_17 {dimension_numbers = #tpu.dot_dimension_numbers<[2], [2], [1], [1], [0, 0, 0, 1, 1, 1], [0], [0]>} : vector<4x16x8xf32>, vector<4x16x8xf32>, vector<4x16x16xf32> -> vector<4x16x16xf32>
    %cst_18 = arith.constant -1.000000e+30 : f32
    "tpu.trace_stop"() : () -> ()
    %65 = vector.shape_cast %7 : vector<1x16x16xi1> to vector<1x16x16xi1>
    %66 = vector.broadcast %65 : vector<1x16x16xi1> to vector<4x16x16xi1>
    %67 = vector.broadcast %cst_18 : f32 to vector<4x16x16xf32>
    %68 = arith.select %66, %64, %67 : vector<4x16x16xi1>, vector<4x16x16xf32>
    %cst_19 = arith.constant dense<0xFF800000> : vector<4x16xf32>
    %69 = vector.multi_reduction <maximumf>, %68, %cst_19 [2] : vector<4x16x16xf32> to vector<4x16xf32>
    %70 = vector.shape_cast %69 : vector<4x16xf32> to vector<4x16x1xf32>
    %71 = vector.broadcast %70 : vector<4x16x1xf32> to vector<4x16x16xf32>
    %72 = arith.subf %68, %71 : vector<4x16x16xf32>
    %73 = math.exp %72 : vector<4x16x16xf32>
    %cst_20 = arith.constant dense<0.000000e+00> : vector<4x16xf32>
    %74 = vector.multi_reduction <add>, %73, %cst_20 [2] : vector<4x16x16xf32> to vector<4x16xf32>
    %75 = vector.shape_cast %74 : vector<4x16xf32> to vector<4x16x1xf32>
    %76 = tpu.reciprocal %75 {approx = true} : vector<4x16x1xf32> -> vector<4x16x1xf32>
    %77 = vector.broadcast %76 : vector<4x16x1xf32> to vector<4x16x16xf32>
    %78 = arith.mulf %73, %77 : vector<4x16x16xf32>
    "tpu.trace_start"() <{level = 10 : i32, message = "bqk,bkd->bqd"}> : () -> ()
    %cst_21 = arith.constant dense<0.000000e+00> : vector<4x16x8xf32>
    %79 = tpu.matmul %78, %63, %cst_21 {dimension_numbers = #tpu.dot_dimension_numbers<[2], [1], [1], [2], [0, 0, 0, 1, 1, 2], [0], [0]>} : vector<4x16x16xf32>, vector<4x16x8xf32>, vector<4x16x8xf32> -> vector<4x16x8xf32>
    "tpu.trace_stop"() : () -> ()
    %80 = vector.extract_strided_slice %3 {offsets = [0, 24], sizes = [64, 8], strides = [1, 1]} : vector<64x96xf32> to vector<64x8xf32>
    %81 = vector.shape_cast %80 : vector<64x8xf32> to vector<4x16x8xf32>
    %cst_22 = arith.constant -4.000000e+00 : f32
    %82 = vector.broadcast %cst_22 : f32 to vector<4x16x8xf32>
    %83 = arith.mulf %81, %82 : vector<4x16x8xf32>
    %84 = vector.extract_strided_slice %3 {offsets = [0, 56], sizes = [64, 8], strides = [1, 1]} : vector<64x96xf32> to vector<64x8xf32>
    %85 = vector.shape_cast %84 : vector<64x8xf32> to vector<4x16x8xf32>
    %86 = vector.extract_strided_slice %3 {offsets = [0, 88], sizes = [64, 8], strides = [1, 1]} : vector<64x96xf32> to vector<64x8xf32>
    %87 = vector.shape_cast %86 : vector<64x8xf32> to vector<4x16x8xf32>
    "tpu.trace_start"() <{level = 10 : i32, message = "bqd,bkd->bqk"}> : () -> ()
    %cst_23 = arith.constant dense<0.000000e+00> : vector<4x16x16xf32>
    %88 = tpu.matmul %83, %85, %cst_23 {dimension_numbers = #tpu.dot_dimension_numbers<[2], [2], [1], [1], [0, 0, 0, 1, 1, 1], [0], [0]>} : vector<4x16x8xf32>, vector<4x16x8xf32>, vector<4x16x16xf32> -> vector<4x16x16xf32>
    %cst_24 = arith.constant -1.000000e+30 : f32
    "tpu.trace_stop"() : () -> ()
    %89 = vector.shape_cast %7 : vector<1x16x16xi1> to vector<1x16x16xi1>
    %90 = vector.broadcast %89 : vector<1x16x16xi1> to vector<4x16x16xi1>
    %91 = vector.broadcast %cst_24 : f32 to vector<4x16x16xf32>
    %92 = arith.select %90, %88, %91 : vector<4x16x16xi1>, vector<4x16x16xf32>
    %cst_25 = arith.constant dense<0xFF800000> : vector<4x16xf32>
    %93 = vector.multi_reduction <maximumf>, %92, %cst_25 [2] : vector<4x16x16xf32> to vector<4x16xf32>
    %94 = vector.shape_cast %93 : vector<4x16xf32> to vector<4x16x1xf32>
    %95 = vector.broadcast %94 : vector<4x16x1xf32> to vector<4x16x16xf32>
    %96 = arith.subf %92, %95 : vector<4x16x16xf32>
    %97 = math.exp %96 : vector<4x16x16xf32>
    %cst_26 = arith.constant dense<0.000000e+00> : vector<4x16xf32>
    %98 = vector.multi_reduction <add>, %97, %cst_26 [2] : vector<4x16x16xf32> to vector<4x16xf32>
    %99 = vector.shape_cast %98 : vector<4x16xf32> to vector<4x16x1xf32>
    %100 = tpu.reciprocal %99 {approx = true} : vector<4x16x1xf32> -> vector<4x16x1xf32>
    %101 = vector.broadcast %100 : vector<4x16x1xf32> to vector<4x16x16xf32>
    %102 = arith.mulf %97, %101 : vector<4x16x16xf32>
    "tpu.trace_start"() <{level = 10 : i32, message = "bqk,bkd->bqd"}> : () -> ()
    %cst_27 = arith.constant dense<0.000000e+00> : vector<4x16x8xf32>
    %103 = tpu.matmul %102, %87, %cst_27 {dimension_numbers = #tpu.dot_dimension_numbers<[2], [1], [1], [2], [0, 0, 0, 1, 1, 2], [0], [0]>} : vector<4x16x16xf32>, vector<4x16x8xf32>, vector<4x16x8xf32> -> vector<4x16x8xf32>
    "tpu.trace_stop"() : () -> ()
    %104 = tpu.concatenate %31, %55, %79, %103 in 2 : vector<4x16x8xf32>, vector<4x16x8xf32>, vector<4x16x8xf32>, vector<4x16x8xf32> -> vector<4x16x32xf32>
    %105 = vector.shape_cast %104 : vector<4x16x32xf32> to vector<64x32xf32>
    %c0_28 = arith.constant 0 : index
    %c0_29 = arith.constant 0 : index
    %106 = vector.load %arg3[%c0_28, %c0_29] : memref<32x32xf32, #tpu.memory_space<vmem>>, vector<32x32xf32>
    %cst_30 = arith.constant dense<0.000000e+00> : vector<64x32xf32>
    %107 = tpu.matmul %105, %106, %cst_30 {dimension_numbers = #tpu.dot_dimension_numbers<[1], [0], [0], [1], [0, 0, 1, 1], [], []>} : vector<64x32xf32>, vector<32x32xf32>, vector<64x32xf32> -> vector<64x32xf32>
    %c0_31 = arith.constant 0 : index
    %c0_32 = arith.constant 0 : index
    %108 = vector.load %arg4[%c0_31, %c0_32] : memref<1x32xf32, #tpu.memory_space<vmem>>, vector<1x32xf32>
    %109 = vector.broadcast %108 : vector<1x32xf32> to vector<64x32xf32>
    %110 = arith.addf %107, %109 : vector<64x32xf32>
    %c0_33 = arith.constant 0 : index
    %c0_34 = arith.constant 0 : index
    %111 = vector.load %arg5[%c0_33, %c0_34] : memref<32x128xf32, #tpu.memory_space<vmem>>, vector<32x128xf32>
    %cst_35 = arith.constant dense<0.000000e+00> : vector<64x128xf32>
    %112 = tpu.matmul %110, %111, %cst_35 {dimension_numbers = #tpu.dot_dimension_numbers<[1], [0], [0], [1], [0, 0, 1, 1], [], []>} : vector<64x32xf32>, vector<32x128xf32>, vector<64x128xf32> -> vector<64x128xf32>
    %c0_36 = arith.constant 0 : index
    %c0_37 = arith.constant 0 : index
    %113 = vector.load %arg6[%c0_36, %c0_37] : memref<1x128xf32, #tpu.memory_space<vmem>>, vector<1x128xf32>
    %114 = vector.broadcast %113 : vector<1x128xf32> to vector<64x128xf32>
    %115 = arith.addf %112, %114 : vector<64x128xf32>
    %116 = vector.shape_cast %115 : vector<64x128xf32> to vector<4x16x128xf32>
    %c0_38 = arith.constant 0 : index
    %c0_39 = arith.constant 0 : index
    %c0_40 = arith.constant 0 : index
    %117 = vector.load %arg7[%c0_38, %c0_39, %c0_40] : memref<4x16x128xf32, #tpu.memory_space<vmem>>, vector<4x16x128xf32>
    tpu.vector_store %arg7[%c0_38, %c0_39, %c0_40], %116 {strides = array<i32>} : memref<4x16x128xf32, #tpu.memory_space<vmem>>, vector<4x16x128xf32>,
    return
  }
  func.func @transform_0(%arg0: i32) -> (i32, i32, i32) {
    %c0_i32 = arith.constant 0 : i32
    %c0_i32_0 = arith.constant 0 : i32
    %c0_i32_1 = arith.constant 0 : i32
    return %arg0, %c0_i32, %c0_i32_0 : i32, i32, i32
  }
  func.func @transform_1(%arg0: i32) -> (i32, i32) {
    %c0_i32 = arith.constant 0 : i32
    %c0_i32_0 = arith.constant 0 : i32
    %c0_i32_1 = arith.constant 0 : i32
    return %c0_i32, %c0_i32_0 : i32, i32
  }
  func.func @transform_2(%arg0: i32) -> (i32, i32) {
    %c0_i32 = arith.constant 0 : i32
    %c0_i32_0 = arith.constant 0 : i32
    %c0_i32_1 = arith.constant 0 : i32
    return %c0_i32, %c0_i32_0 : i32, i32
  }
  func.func @transform_3(%arg0: i32) -> (i32, i32) {
    %c0_i32 = arith.constant 0 : i32
    %c0_i32_0 = arith.constant 0 : i32
    %c0_i32_1 = arith.constant 0 : i32
    return %c0_i32, %c0_i32_0 : i32, i32
  }
  func.func @transform_4(%arg0: i32) -> (i32, i32) {
    %c0_i32 = arith.constant 0 : i32
    %c0_i32_0 = arith.constant 0 : i32
    %c0_i32_1 = arith.constant 0 : i32
    return %c0_i32, %c0_i32_0 : i32, i32
  }
  func.func @transform_5(%arg0: i32) -> (i32, i32) {
    %c0_i32 = arith.constant 0 : i32
    %c0_i32_0 = arith.constant 0 : i32
    %c0_i32_1 = arith.constant 0 : i32
    return %c0_i32, %c0_i32_0 : i32, i32
  }
  func.func @transform_6(%arg0: i32) -> (i32, i32, i32) {
    %c0_i32 = arith.constant 0 : i32
    %c0_i32_0 = arith.constant 0 : i32
    %c0_i32_1 = arith.constant 0 : i32
    return %arg0, %c0_i32, %c0_i32_0 : i32, i32, i32
  }
}

</mosaic_0001>

<bundles_post_ra>
// kernel: tpu_custom_call.1
= control target key start
LH: loop header
LB: loop body
LE: loop exit
PB: predicated region body
PF: predicated region fallthrough
CT: control target
= control target key end

     0   :  { %11 = vsyncpa [#allocation3], 0  ;;  %s6663_s0 = inlined_call_operand.hbm [shape: f32[8,16,32], index: 0, kind: input, shape index: {}]   ;;  %s6664_s1 = inlined_call_operand.hbm [shape: f32[32,96], index: 1, kind: input, shape index: {}]   ;;  %s6665_s2 = inlined_call_operand.hbm [shape: f32[32,32], index: 2, kind: input, shape index: {}]   ;;  %s6666_s3 = inlined_call_operand.vmem [shape: f32[1,32], index: 3, kind: input, shape index: {}]   ;;  %s6667_s4 = inlined_call_operand.hbm [shape: f32[32,128], index: 4, kind: input, shape index: {}]   ;;  %s6668_s5 = inlined_call_operand.vmem [shape: f32[1,128], index: 5, kind: input, shape index: {}]   ;;  %s6669_s6 = inlined_call_operand.hbm [shape: f32[8,16,128], index: 6, kind: output, shape index: {}]  }
   0x1   :  { %13 = vsyncpa [#allocation3 + $0x1], 0 }
   0x2   :  { %14 = vsyncpa [#allocation6], 0 }
   0x3   :  { %15 = vsyncpa [#allocation9], 0 }
   0x4   :  { %16 = vsyncpa [#allocation4], 0 }
   0x5   :  { %18 = vsyncpa [#allocation4 + $0x1], 0  ;;  %s5647_s21 = smov 0   ;;  %s5649_s22 = smov 0  }
   0x6   :  { %s5651_s23 = smov 0   ;;  %s5653_s24 = smov 0  }
   0x7 LB: > { %s5668_s25 = sadd.s32 4294967295, %s5588_s24   ;;  %s4238_s26 = sadd.s32 4294967294, %s5588_s24   ;;  %s5588_s24 = sphi %s5653_s24, %s6698_s24   ;;  %s5584_s23 = sphi %s5651_s23, %s6697_s23   ;;  %s5580_s22 = sphi %s5649_s22, %s6696_s22   ;;  %s5576_s21 = sphi %s5647_s21, %s6695_s21  }
   0x8   : > { %p44_p0 = scmp.ne.s32.totalorder %s5580_s22, %s5576_s21  ;;  %p6670_p1 = scmp.eq.s32.totalorder %s5668_s25, 0 }
   0x9   : > { %p179_p3 = scmp.eq.s32.totalorder %s4238_s26, 1  ;;  %p4239_p5 = scmp.ge.s32.totalorder %s5588_s24, 1 }
   0xa   : > { %p5677_p4 = por %p6670_p1, %p44_p0  ;;  %p186_p7 = scmp.lt.s32.totalorder %s5588_s24, 3 }
   0xb   : > { %p5682_p6 = por %p179_p3, %p44_p0  ;;  %s5590_s30 = smov [#allocation5]  }
   0xc   : > { %s6673_s27 = scalar_select %p5677_p4, 1, 0 }
   0xd   : > { %s6674_s28 = scalar_select %p5682_p6, 1, 0 }
   0xe   : > { %p5687_p8 = pnand %p4239_p5, %p186_p7  ;;  %s198_s7 = sshll.u32 %s5590_s30, 4  ;;  %s5691_s7 = int_to_ptr.vmem [resolvable:$true] %s198_s7 }
   0xf   : > { %s5591_s9 = smov [#allocation7]   ;;  %s5592_s11 = smov [#allocation8]  }
  0x10   : > { %s6675_s29 = scalar_select %p5687_p8, 1, 0 }
  0x11   : > { %p5034_p9 = pneg %p5687_p8  ;;  %s211_s10 = sshll.u32 %s5591_s9, 4  ;;  %s5702_s10 = int_to_ptr.vmem [resolvable:$true] %s211_s10 }
  0x12   : > { %s5704_s12 = sshll.u32 %s5592_s11, 4  ;;  %s5400_s15 = scalar_lea.hbm %s6664_s1, 512  ;;  %s228_s12 = int_to_ptr.vmem [resolvable:$true] %s5704_s12 }
  0x13   : > { %p5698_p11 = pnand %p5034_p9, %p6670_p1  ;;  %p5401_p12 = scmp.ne.s32.totalorder %s6664_s1, %s5400_s15 }
  0x14   : > { %p5407_p5 = scmp.lt.u32.totalorder %s5400_s15, %s6664_s1 }
  0x15   : > { %p5714_p13 = pneg %p5698_p11 }
  0x17   : > { %p5403_p0 = pnand %p5714_p13, %p5401_p12 }
  0x19   : > { %p5404_p3 = pneg %p5403_p0 }
  0x1b   : > { %p5409_p7 = pnand %p5407_p5, %p5404_p3 }
  0x1d   : > { %5412 = shalt.err (!%p5409_p7)
}
  0x1e   : > { %s5413_s26 = scalar_lea.vmem %s5691_s7, 512  ;;  %p5421_p2 = scmp.lt.s32.totalorder %s5691_s7, %s5691_s7 }
  0x1f   : > { %p5414_p9 = scmp.ne.s32.totalorder %s5691_s7, %s5413_s26  ;;  %p5422_p6 = scmp.lt.s32.totalorder %s5413_s26, %s5413_s26 }
  0x21   : > { %p5416_p10 = pnand %p5414_p9, %p5714_p13  ;;  %p5423_p12 = por %p5422_p6, %p5421_p2 }
  0x23   : > { %p5417_p1 = pneg %p5416_p10 }
  0x25   : > { %p5424_p0 = pnand %p5423_p12, %p5417_p1 }
  0x27   : > { %5427 = shalt.err (!%p5424_p0)
}
  0x28   : > { %s5593_s30 = smov 128   ;;  %s5594_s9 = smov 8  }
  0x29   : > { %5037 = dma.hbm_to_vmem [thread:$0]  (!%p5698_p11), %s6664_s1, 512, %s5691_s7, [#allocation6], %s5593_s30, %s5593_s30, %s5594_s9  }
  0x2a   : > { %s5428_s16 = scalar_lea.hbm %s6665_s2, 512 }
  0x2b   : > { %p5429_p1 = scmp.ne.s32.totalorder %s6665_s2, %s5428_s16  ;;  %p5435_p10 = scmp.lt.u32.totalorder %s5428_s16, %s6665_s2 }
  0x2d   : > { %p5431_p2 = pnand %p5429_p1, %p5714_p13 }
  0x2f   : > { %p5432_p6 = pneg %p5431_p2 }
  0x31   : > { %p5437_p3 = pnand %p5435_p10, %p5432_p6 }
  0x33   : > { %5440 = shalt.err (!%p5437_p3)
}
  0x34   : > { %s5441_s7 = scalar_lea.vmem %s5702_s10, 512  ;;  %p5449_p12 = scmp.lt.s32.totalorder %s5702_s10, %s5702_s10 }
  0x35   : > { %p5442_p5 = scmp.ne.s32.totalorder %s5702_s10, %s5441_s7  ;;  %p5450_p0 = scmp.lt.s32.totalorder %s5441_s7, %s5441_s7 }
  0x37   : > { %p5444_p7 = pnand %p5442_p5, %p5714_p13  ;;  %p5451_p1 = por %p5450_p0, %p5449_p12 }
  0x39   : > { %p5445_p9 = pneg %p5444_p7 }
  0x3b   : > { %p5452_p2 = pnand %p5451_p1, %p5445_p9 }
  0x3d   : > { %5455 = shalt.err (!%p5452_p2)
}
  0x3e   : > { %5040 = dma.hbm_to_vmem [thread:$0]  (!%p5698_p11), %s6665_s2, 512, %s5702_s10, [#allocation6], %s5593_s30, %s5593_s30, %s5594_s9  }
  0x3f   : > { %s5456_s16 = scalar_lea.hbm %s6667_s4, 512 }
  0x40   : > { %p5457_p6 = scmp.ne.s32.totalorder %s6667_s4, %s5456_s16  ;;  %p5463_p5 = scmp.lt.u32.totalorder %s5456_s16, %s6667_s4 }
  0x42   : > { %p5459_p10 = pnand %p5457_p6, %p5714_p13 }
  0x44   : > { %p5460_p3 = pneg %p5459_p10 }
  0x46   : > { %p5465_p7 = pnand %p5463_p5, %p5460_p3 }
  0x48   : > { %5468 = shalt.err (!%p5465_p7)
}
  0x49   : > { %s5469_s7 = scalar_lea.vmem %s228_s12, 512  ;;  %p5477_p1 = scmp.lt.s32.totalorder %s228_s12, %s228_s12 }
  0x4a   : > { %p5470_p9 = scmp.ne.s32.totalorder %s228_s12, %s5469_s7  ;;  %p5478_p2 = scmp.lt.s32.totalorder %s5469_s7, %s5469_s7 }
  0x4c   : > { %p5472_p12 = pnand %p5470_p9, %p5714_p13  ;;  %p5479_p4 = por %p5478_p2, %p5477_p1 }
  0x4e   : > { %p5473_p0 = pneg %p5472_p12 }
  0x50   : > { %p5480_p8 = pnand %p5479_p4, %p5473_p0 }
  0x52   : > { %5483 = shalt.err (!%p5480_p8)
}
  0x53   : > { %5043 = dma.hbm_to_vmem [thread:$0]  (!%p5698_p11), %s6667_s4, 512, %s228_s12, [#allocation9], %s5593_s30, %s5593_s30, %s5594_s9  }
  0x54   : > { %s5787_s18 = sadd.s32 1, %s5588_s24   ;;  %s31_s13 = sadd.s32 1, %s5584_s23 }
  0x55   : > { %s28_s8 = ssub.s32 %s5588_s24, %s5787_s18  ;;  %p38_p8 = scmp.ne.s32.totalorder %s5584_s23, %s5580_s22 }
  0x56   : > { %p29_p4 = scmp.eq.s32.totalorder %s28_s8, 0  ;;  %p39_p13 = scmp.eq.s32.totalorder %s5588_s24, 0 }
  0x57   : > { %p5055_p6 = scmp.lt.s32.totalorder %s5588_s24, 2  ;;  %p6678_p3 = scmp.eq.s32.totalorder %s5668_s25, 1 }
  0x58   : > { %s5797_s14 = scalar_select %p29_p4, %s5584_s23, %s31_s13  }
  0x59   : > { %p40_p10 = por %p39_p13, %p38_p8  ;;  %p5801_p5 = por %p6678_p3, %p38_p8 }
  0x5a   : > { %s244_s16 = sand.u32 1, %s5584_s23   ;;  %s4383_s17 = sshll.u32 %s5588_s24, 10 }
  0x5b   : > { %s4244_s12 = sshll.u32 %s244_s16, 6  ;;  %s5810_s26 = scalar_lea.hbm %s6663_s0, %s4383_s17 }
  0x5c   : > { %s248_s7 = scalar_lea.vmem [#allocation2], %s4244_s12  ;;  %p5812_p11 = pnand %p5055_p6, %p40_p10 }
  0x5d   : > { %s256_s10 = sshll.u32 %s248_s7, 4  ;;  %s5818_s8 = scalar_lea.sflag [#allocation3], %s244_s16  ;;  %s5816_s10 = int_to_ptr.vmem [resolvable:$true] %s256_s10 }
  0x5e   : > { %s5484_s13 = scalar_lea.hbm %s5810_s26, 1024  ;;  %p5486_p9 = pneg %p5812_p11 }
  0x5f   : > { %p5485_p7 = scmp.ne.s32.totalorder %s5810_s26, %s5484_s13  ;;  %s5489_s19 = scalar_lea.hbm %s6663_s0, 2048 }
  0x60   : > { %p5490_p1 = scmp.lt.u32.totalorder %s5810_s26, %s6663_s0  ;;  %p5491_p2 = scmp.lt.u32.totalorder %s5489_s19, %s5484_s13 }
  0x61   : > { %p5487_p12 = pnand %p5486_p9, %p5485_p7  ;;  %p5493_p8 = scmp.lt.u32.totalorder %s5484_s13, %s5810_s26 }
  0x62   : > { %p5492_p4 = por %p5491_p2, %p5490_p1 }
  0x63   : > { %p5488_p0 = pneg %p5487_p12 }
  0x64   : > { %p5494_p13 = por %p5493_p8, %p5492_p4 }
  0x66   : > { %p5495_p6 = pnand %p5494_p13, %p5488_p0 }
  0x68   : > { %5498 = shalt.err (!%p5495_p6)
}
  0x69   : > { %s5499_s16 = scalar_lea.vmem %s5816_s10, 1024  ;;  %s5595_s17 = smov [#allocation2]  }
  0x6a   : > { %p5500_p10 = scmp.ne.s32.totalorder %s5816_s10, %s5499_s16  ;;  %s5504_s12 = sshll.u32 %s5595_s17, 4  ;;  %s5505_s12 = int_to_ptr.vmem [resolvable:$false] %s5504_s12 }
  0x6b   : > { %s5506_s20 = scalar_lea.vmem %s5505_s12, 2048  ;;  %p5507_p12 = scmp.lt.s32.totalorder %s5816_s10, %s5505_s12 }
  0x6c   : > { %p5502_p3 = pnand %p5500_p10, %p5486_p9  ;;  %p5508_p1 = scmp.lt.s32.totalorder %s5506_s20, %s5499_s16 }
  0x6e   : > { %p5503_p7 = pneg %p5502_p3  ;;  %p5509_p2 = por %p5508_p1, %p5507_p12 }
  0x70   : > { %p5510_p4 = pnand %p5509_p2, %p5503_p7 }
  0x72   : > { %5513 = shalt.err (!%p5510_p4)
}
  0x73   : > { %5047 = dma.hbm_to_vmem [thread:$0]  (!%p5812_p11), %s5810_s26, 1024, %s5816_s10, %s5818_s8, %s5593_s30, %s5593_s30, %s5594_s9  }
  0x74   : > { %p6681_p9 = scmp.ne.s32.totalorder %s6675_s29, 0 }
  0x75   : > { %s5852_s13 = sand.u32 (!%p6681_p9), 1, %s5580_s22   ;;  %p6682_p0 = scmp.ne.s32.totalorder (!%p6681_p9), %s6673_s27, 0 }
  0x76   : > { %268 = sbr.rel (%p6681_p9) target bundleno = 3649 (0xe41), region = 44  ;;  %s4249_s19 = sshll.u32 (!%p6681_p9), %s5852_s13, 6 }
  0x77   : > { %s271_s7 = scalar_lea.sflag (!%p6681_p9), [#allocation3], %s5852_s13  ;;  %s5858_s11 = scalar_lea.vmem (!%p6681_p9), [#allocation2], %s4249_s19 }
  0x7d   : > { %5559 = dma.done.wait (%p6682_p0), %s271_s7, 1024  }
  0x7e   : > { %5561 = vsyncadd (%p6682_p0), %s271_s7, 4294966272  ;;  %p6683_p11 = scmp.eq.s32.totalorder %s5668_s25, 0 }
  0x80   : > { %5563 = dma.done.wait (%p6683_p11), [#allocation6], 1024   ;;  %p6684_p8 = pmov %p6683_p11 }
  0x82   : > { %5565 = vsyncadd (%p6684_p8), [#allocation6], 4294966272  ;;  %p6685_p13 = pmov %p6684_p8 }
  0x83   : > { %p6686_p6 = pmov %p6684_p8 }
  0x84   : > { %5567 = dma.done.wait (%p6685_p13), [#allocation9], 512  }
  0x85   : > { %5569 = vsyncadd (%p6686_p6), [#allocation9], 4294966784  ;;  %vm329_vm0 = vcmask 261120   ;;  %v325_v0 = vld [vmem:[#allocation5] sm:$0xff]  ;;  %v326_v1 = vld [vmem:[#allocation5 + $0x8] sm:$0xff]  ;;  %vm480_vm1 = vcmask 64512   ;;  %v459_v51 = vlaneseq }
  0x86   : > { %v327_v2 = vld [vmem:[#allocation5 + $0x10] sm:$0xff]  ;;  %v4834_v3 = vpack.c.bf16 %v326_v1, %v325_v0  ;;  %v328_v4 = vld [vmem:[#allocation5 + $0x18] sm:$0xff]  ;;  %v317_v5 = vld [vmem:[%s5858_s11] sm:$0xff]  ;;  %s5596_s27 = smov 96   ;;  %vm851_vm5 = vcmask 130048   ;;  %s5597_s29 = smov 64  }
  0x87   : > { %v4838_v6 = vpack.c.bf16 %v328_v4, %v327_v2  ;;  %4558 = vmatprep.mubr.msk.f32.mxu0 %vm329_vm0, %v317_v5  ;;  %v318_v7 = vld [vmem:[%s5858_s11 + $0x8] sm:$0xff]  ;;  %v319_v8 = vld [vmem:[%s5858_s11 + $0x10] sm:$0xff]  ;;  %v320_v9 = vld [vmem:[%s5858_s11 + $0x18] sm:$0xff]  ;;  %v460_v52 = vshrl.u32 %v459_v51, 7  ;;  %v463_v54 = vand.u32 127, %v459_v51  ;;  %s5598_s30 = smov 88  }
  0x88   : > { %4835 = vmatprep.subr.bf16.mxu0 %v4834_v3  ;;  %v321_v10 = vld [vmem:[%s5858_s11 + $0x20] sm:$0xff]  ;;  %v322_v11 = vld [vmem:[%s5858_s11 + $0x28] sm:$0xff]  ;;  %v323_v12 = vld [vmem:[%s5858_s11 + $0x30] sm:$0xff]  ;;  %s5599_s9 = smov 120   ;;  %s5600_s26 = smov 56   ;;  %vm3824_vm6 = vcmask 195584  }
  0x89   : > { %4837 = vmatpush3.bf16.msra.mxu0 %v4834_v3  ;;  %v324_v13 = vld [vmem:[%s5858_s11 + $0x38] sm:$0xff]  ;;  %vm5910_vm2 = vmpackc.low %vm480_vm1, %vm480_vm1  ;;  %v461_v53 = vadd.s32 8, %v460_v52  ;;  %vm5958_vm4 = vcmp.ge.s32.totalorder %v460_v52, %v463_v54  ;;  %s5601_s10 = smov 80   ;;  %s5602_s8 = smov 112  }
  0x8a   : > { %4839 = vmatprep.subr.bf16.mxu0 %v4838_v6  ;;  %s5603_s16 = smov 48   ;;  %s5604_s17 = smov 72  }
  0x8b   : > { %vm5954_vm3 = vcmp.ge.s32.totalorder %v461_v53, %v463_v54  ;;  %s5605_s12 = smov 104   ;;  %s5606_s20 = smov 40  }
  0x8c   : > { %s5607_s7 = smov 8   ;;  %s5608_s11 = smov 16  }
  0x8d   : > { %4841 = vmatpush3.bf16.msra.mxu0 %v4838_v6 }
  0x90   : > { %4559 = vmatmul.mubr.msk.f32.vlgmr.msra.gmra.mrb[0].mxu0 %vm329_vm0, %v318_v7 }
  0x91   : > { %4561 = vmatprep.mubr.msk.f32.mxu0 %vm329_vm0, %v319_v8 }
  0x94   : > { %4562 = vmatmul.mubr.msk.f32.gmra.mrb[2].mxu0 %vm329_vm0, %v320_v9 }
  0x95   : > { %4564 = vmatprep.mubr.msk.f32.mxu0 %vm329_vm0, %v321_v10 }
  0x98   : > { %4565 = vmatmul.mubr.msk.f32.gmra.mrb[4].mxu0 %vm329_vm0, %v322_v11 }
  0x99   : > { %4567 = vmatprep.mubr.msk.f32.mxu0 %vm329_vm0, %v323_v12 }
  0x9c   : > { %4568 = vmatmul.mubr.msk.f32.gmra.mrb[6].mxu0 %vm329_vm0, %v324_v13 }
 0x163   : > { %v4560_v14 = vpop.f32.mrb[0].mxu0 }
 0x164   : > { %v420_v15 = vpop.f32.mrb[1].mxu0  ;;  %v5920_v41 = vmul.f32 -4.0, %v4560_v14 }
 0x165   : > { %v5888_v16 = vpack.i.bf16 %v4560_v14, %v420_v15  ;;  %v5890_v17 = vmul.f32 -4.0, %v420_v15 }
 0x167   : > { %5113 = vrot.lane.b32.xlu0 %v5888_v16, %s5596_s27  ;;  %v4563_v18 = vpop.f32.mrb[2].mxu0  ;;  %4574 = vmatprep.mubr.msk.f32.mxu1 %vm480_vm1, %v5890_v17 }
 0x168   : > { %v430_v19 = vpop.f32.mrb[3].mxu0  ;;  %v5936_v47 = vmul.f32 -4.0, %v4563_v18 }
 0x169   : > { %v5895_v20 = vpack.i.bf16 %v4563_v18, %v430_v19  ;;  %v5922_v42 = vmul.f32 -4.0, %v430_v19 }
 0x16b   : > { %5118 = vrot.lane.b32.xlu0 %v5895_v20, %s5596_s27  ;;  %v4566_v21 = vpop.f32.mrb[4].mxu0 }
 0x16c   : > { %v440_v22 = vpop.f32.mrb[5].mxu0  ;;  %v5938_v48 = vmul.f32 -4.0, %v4566_v21 }
 0x16d   : > { %v5898_v23 = vpack.i.bf16 %v4566_v21, %v440_v22  ;;  %v5900_v24 = vmul.f32 -4.0, %v440_v22 }
 0x16f   : > { %5123 = vrot.lane.b32.xlu1 %v5898_v23, %s5596_s27  ;;  %4588 = vmatprep.mubr.msk.f32.mxu0 %vm480_vm1, %v5900_v24  ;;  %v4569_v25 = vpop.f32.mrb[6].mxu0 }
 0x170   : > { %v450_v26 = vpop.f32.mrb[7].mxu0  ;;  %v5950_v50 = vmul.f32 -4.0, %v4569_v25 }
 0x171   : > { %v5905_v27 = vpack.i.bf16 %v4569_v25, %v450_v26  ;;  %v5942_v49 = vmul.f32 -4.0, %v450_v26 }
 0x173   : > { %5128 = vrot.lane.b32.xlu1 %v5905_v27, %s5596_s27  ;;  %s5609_s27 = smov 24  }
 0x1d9   : > { %v5114_v28 = vpop.permute.xlu0 %5113 }
 0x1da   : > { %v5116_v29 = vunpack.i.h.bf16 %v5114_v28  ;;  %v5115_v30 = vunpack.i.l.bf16 %v5114_v28 }
 0x1dc   : > { %v4842_v32 = vpack.c.bf16 %v5116_v29, %v5115_v30 }
 0x1dd   : > { %v5119_v33 = vpop.permute.xlu0 %5118 }
 0x1de   : > { %v5121_v34 = vunpack.i.h.bf16 %v5119_v33  ;;  %v5120_v35 = vunpack.i.l.bf16 %v5119_v33  ;;  %4844 = vmatprep.subr.msk.bf16.mxu1 %vm5910_vm2, %v4842_v32 }
 0x1df   : > { %4847 = vmatpush3.bf16.xpose.msk.msra.mxu1 %vm5910_vm2, %v4842_v32 }
 0x1e0   : > { %v4848_v36 = vpack.c.bf16 %v5121_v34, %v5120_v35 }
 0x1e1   : > { %v5124_v37 = vpop.permute.xlu1 %5123 }
 0x1e2   : > { %v5126_v38 = vunpack.i.h.bf16 %v5124_v37  ;;  %v5125_v39 = vunpack.i.l.bf16 %v5124_v37  ;;  %4850 = vmatprep.subr.msk.bf16.mxu1 %vm5910_vm2, %v4848_v36 }
 0x1e4   : > { %v4854_v40 = vpack.c.bf16 %v5126_v38, %v5125_v39 }
 0x1e5   : > { %v5129_v43 = vpop.permute.xlu1 %5128 }
 0x1e6   : > { %4575 = vmatmul.mubr.msk.f32.vlgmr.msra.gmra.mrb[0].mxu1 %vm480_vm1, %v5920_v41  ;;  %4856 = vmatprep.subr.msk.bf16.mxu0 %vm5910_vm2, %v4854_v40  ;;  %v5131_v44 = vunpack.i.h.bf16 %v5129_v43  ;;  %v5130_v45 = vunpack.i.l.bf16 %v5129_v43 }
 0x1e7   : > { %4853 = vmatpush3.bf16.xpose.msk.msra.mxu1 %vm5910_vm2, %v4848_v36  ;;  %4581 = vmatprep.mubr.msk.f32.mxu1 %vm480_vm1, %v5922_v42 }
 0x1e8   : > { %4859 = vmatpush3.bf16.xpose.msk.msra.mxu0 %vm5910_vm2, %v4854_v40  ;;  %v4860_v46 = vpack.c.bf16 %v5131_v44, %v5130_v45 }
 0x1ea   : > { %4862 = vmatprep.subr.msk.bf16.mxu1 %vm5910_vm2, %v4860_v46 }
 0x1ee   : > { %4582 = vmatmul.mubr.msk.f32.vlgmr.msra.gmra.mrb[2].mxu1 %vm480_vm1, %v5936_v47 }
 0x1ef   : > { %4589 = vmatmul.mubr.msk.f32.vlgmr.msra.gmra.mrb[8].mxu0 %vm480_vm1, %v5938_v48  ;;  %4865 = vmatpush3.bf16.xpose.msk.msra.mxu1 %vm5910_vm2, %v4860_v46 }
 0x1f0   : > { %4595 = vmatprep.mubr.msk.f32.mxu1 %vm480_vm1, %v5942_v49 }
 0x1f6   : > { %4596 = vmatmul.mubr.msk.f32.vlgmr.msra.gmra.mrb[4].mxu1 %vm480_vm1, %v5950_v50 }
 0x2b9   : > { %v4576_v57 = vpop.f32.mrb[0].mxu1 }
 0x2ba   : > { %v844_v58 = vsel %vm5954_vm3, %v4576_v57, -1e+30  ;;  %v557_v59 = vpop.f32.mrb[1].mxu1 }
 0x2bb   : > { %v843_v60 = vsel %vm5958_vm4, %v557_v59, -1e+30  ;;  %v855_v61 = vsel %vm851_vm5, %v844_v58, -inf }
 0x2bc   : > { %856 = vmax.xlane.f32.xlu1 %v855_v61  ;;  %v852_v62 = vsel %vm851_vm5, %v843_v60, -inf }
 0x2bd   : > { %853 = vmax.xlane.f32.xlu0 %v852_v62 }
 0x2c1   : > { %v4583_v63 = vpop.f32.mrb[2].mxu1 }
 0x2c2   : > { %v4590_v0 = vpop.f32.mrb[8].mxu0  ;;  %v648_v1 = vpop.f32.mrb[3].mxu1  ;;  %v846_v6 = vsel %vm5954_vm3, %v4583_v63, -1e+30 }
 0x2c3   : > { %v845_v2 = vsel %vm5958_vm4, %v648_v1, -1e+30  ;;  %v739_v3 = vpop.f32.mrb[9].mxu0  ;;  %v861_v8 = vsel %vm851_vm5, %v846_v6, -inf  ;;  %v848_v9 = vsel %vm5954_vm3, %v4590_v0, -1e+30 }
 0x2c4   : > { %v847_v4 = vsel %vm5958_vm4, %v739_v3, -1e+30  ;;  %v858_v5 = vsel %vm851_vm5, %v845_v2, -inf  ;;  %v867_v12 = vsel %vm851_vm5, %v848_v9, -inf }
 0x2c5   : > { %859 = vmax.xlane.f32.xlu0 %v858_v5  ;;  %v864_v7 = vsel %vm851_vm5, %v847_v4, -inf }
 0x2c6   : > { %865 = vmax.xlane.f32.xlu1 %v864_v7 }
 0x2c9   : > { %862 = vmax.xlane.f32.xlu0 %v861_v8  ;;  %v4597_v10 = vpop.f32.mrb[4].mxu1 }
 0x2ca   : > { %v830_v11 = vpop.f32.mrb[5].mxu1  ;;  %v5982_v13 = vsel %vm5954_vm3, %v4597_v10, -1e+30 }
 0x2cb   : > { %v873_v14 = vsel %vm851_vm5, %v5982_v13, -inf  ;;  %v5998_v15 = vsel %vm5958_vm4, %v830_v11, -1e+30 }
 0x2cc   : > { %v870_v18 = vsel %vm851_vm5, %v5998_v15, -inf }
 0x2cd   : > { %868 = vmax.xlane.f32.xlu0 %v867_v12 }
 0x2d1   : > { %874 = vmax.xlane.f32.xlu0 %v873_v14 }
 0x2d7   : > { %5133 = vrot.lane.b32.xlu1 %v5888_v16, %s5597_s29 }
 0x2db   : > { %5143 = vrot.lane.b32.xlu1 %v5898_v23, %s5597_s29 }
 0x2df   : > { %5148 = vrot.lane.b32.xlu1 %v5905_v27, %s5597_s29 }
 0x2e3   : > { %5158 = vrot.lane.b32.xlu1 %v5895_v20, %s5598_s30 }
 0x2e7   : > { %5138 = vrot.lane.b32.xlu0 %v5895_v20, %s5597_s29 }
 0x2eb   : > { %5153 = vrot.lane.b32.xlu0 %v5888_v16, %s5598_s30 }
 0x2ef   : > { %1288 = vrot.lane.b32.xlu0 %v5890_v17, %s5599_s9 }
 0x307   : > { %871 = vmax.xlane.f32.xlu1 %v870_v18 }
 0x318   : > { %5163 = vrot.lane.b32.xlu1 %v5898_v23, %s5598_s30 }
 0x349   : > { %v857_v19 = vpop.xlane.xlu1 %856 }
 0x34a   : > { %v877_v21 = vsub.f32 %v844_v58, %v857_v19  ;;  %v854_v22 = vpop.xlane.xlu0 %853 }
 0x34b   : > { %v876_v25 = vsub.f32 %v843_v60, %v854_v22 }
 0x34c   : > { %v886_v26 = vmul.f32 1.442695, %v877_v21 }
 0x34d   : > { %v884_v28 = vmul.f32 1.442695, %v876_v25 }
 0x34e   : > { %5272 = vpow2.f32 %v886_v26 }
 0x34f   : > { %5274 = vpow2.f32 %v884_v28 }
 0x352   : > { %v860_v29 = vpop.xlane.xlu0 %859 }
 0x353   : > { %v878_v30 = vsub.f32 %v845_v2, %v860_v29  ;;  %v866_v32 = vpop.xlane.xlu1 %865 }
 0x354   : > { %v880_v33 = vsub.f32 %v847_v4, %v866_v32 }
 0x355   : > { %v888_v34 = vmul.f32 1.442695, %v878_v30 }
 0x356   : > { %v892_v35 = vmul.f32 1.442695, %v880_v33  ;;  %v863_v36 = vpop.xlane.xlu0 %862 }
 0x357   : > { %5276 = vpow2.f32 %v888_v34  ;;  %v879_v37 = vsub.f32 %v846_v6, %v863_v36  ;;  %v5134_v38 = vpop.permute.xlu1 %5133 }
 0x358   : > { %v6004_v39 = vpop.eup %5272  ;;  %v5136_v40 = vunpack.i.h.bf16 %v5134_v38  ;;  %v5135_v43 = vunpack.i.l.bf16 %v5134_v38  ;;  %5278 = vpow2.f32 %v892_v35 }
 0x359   : > { %v6006_v44 = vpop.eup %5274  ;;  %v890_v45 = vmul.f32 1.442695, %v879_v37  ;;  %v903_v46 = vsel %vm851_vm5, %v6004_v39, 0.0 }
 0x35a   : > { %v869_v51 = vpop.xlane.xlu0 %868  ;;  %904 = vadd.xlane.f32.xlu0 %v903_v46  ;;  %v4866_v52 = vpack.c.bf16 %v5136_v40, %v5135_v43  ;;  %v900_v53 = vsel %vm851_vm5, %v6006_v44, 0.0 }
 0x35b   : > { %5280 = vpow2.f32 %v890_v45  ;;  %v881_v54 = vsub.f32 %v848_v9, %v869_v51  ;;  %v5144_v57 = vpop.permute.xlu1 %5143  ;;  %901 = vadd.xlane.f32.xlu1 %v900_v53 }
 0x35c   : > { %v5146_v58 = vunpack.i.h.bf16 %v5144_v57  ;;  %v5145_v59 = vunpack.i.l.bf16 %v5144_v57  ;;  %4867 = vmatprep.subr.bf16.mxu0 %v4866_v52 }
 0x35d   : > { %v894_v60 = vmul.f32 1.442695, %v881_v54  ;;  %4869 = vmatpush3.bf16.msra.mxu0 %v4866_v52 }
 0x35e   : > { %v875_v61 = vpop.xlane.xlu0 %874  ;;  %v6012_v62 = vpack.c.bf16 %v5146_v58, %v5145_v59 }
 0x35f   : > { %5282 = vpow2.f32 %v894_v60  ;;  %v5149_v63 = vpop.permute.xlu1 %5148  ;;  %v883_v0 = vsub.f32 %v5982_v13, %v875_v61 }
 0x360   : > { %4875 = vmatprep.subr.bf16.mxu0 %v6012_v62  ;;  %v5151_v3 = vunpack.i.h.bf16 %v5149_v63  ;;  %v5150_v6 = vunpack.i.l.bf16 %v5149_v63 }
 0x361   : > { %v6016_v1 = vpop.eup %5276  ;;  %v898_v2 = vmul.f32 1.442695, %v883_v0 }
 0x362   : > { %v5139_v4 = vpop.permute.xlu0 %5138  ;;  %v906_v5 = vsel %vm851_vm5, %v6016_v1, 0.0  ;;  %v6020_v9 = vpop.eup %5278  ;;  %v6028_v14 = vpack.c.bf16 %v5151_v3, %v5150_v6 }
 0x363   : > { %5284 = vpow2.f32 %v898_v2  ;;  %v5141_v7 = vunpack.i.h.bf16 %v5139_v4  ;;  %v5140_v8 = vunpack.i.l.bf16 %v5139_v4  ;;  %907 = vadd.xlane.f32.xlu1 %v906_v5  ;;  %v912_v13 = vsel %vm851_vm5, %v6020_v9, 0.0  ;;  %v5159_v25 = vpop.permute.xlu1 %5158 }
 0x364   : > { %v5161_v60 = vunpack.i.h.bf16 %v5159_v25  ;;  %v5160_v61 = vunpack.i.l.bf16 %v5159_v25 }
 0x365   : > { %v6022_v10 = vpop.eup %5280  ;;  %v4870_v11 = vpack.c.bf16 %v5141_v7, %v5140_v8 }
 0x366   : > { %v909_v12 = vsel %vm851_vm5, %v6022_v10, 0.0  ;;  %v5154_v33 = vpop.permute.xlu0 %5153 }
 0x367   : > { %910 = vadd.xlane.f32.xlu0 %v909_v12  ;;  %4871 = vmatprep.subr.bf16.mxu1 %v4870_v11  ;;  %v5156_v43 = vunpack.i.h.bf16 %v5154_v33  ;;  %v5155_v45 = vunpack.i.l.bf16 %v5154_v33 }
 0x368   : > { %913 = vadd.xlane.f32.xlu1 %v912_v13  ;;  %4873 = vmatpush3.bf16.msra.mxu1 %v4870_v11 }
 0x369   : > { %v6030_v18 = vpop.eup %5282  ;;  %4879 = vmatprep.subr.bf16.mxu1 %v6028_v14  ;;  %v4882_v54 = vpack.c.bf16 %v5156_v43, %v5155_v45 }
 0x36a   : > { %v915_v19 = vsel %vm851_vm5, %v6030_v18, 0.0  ;;  %v1289_v34 = vpop.permute.xlu0 %1288 }
 0x36b   : > { %916 = vadd.xlane.f32.xlu0 %v915_v19 }
 0x36d   : > { %v6035_v21 = vpop.eup %5284 }
 0x36e   : > { %v921_v22 = vsel %vm851_vm5, %v6035_v21, 0.0 }
 0x36f   : > { %922 = vadd.xlane.f32.xlu0 %v921_v22 }
 0x379   : > { %1379 = vrot.lane.b32.xlu1 %v5922_v42, %s5599_s9 }
 0x385   : > { %1290 = vrot.lane.b32.xlu0 %v5920_v41, %s5599_s9 }
 0x389   : > { %5168 = vrot.lane.b32.xlu0 %v5905_v27, %s5598_s30 }
 0x38d   : > { %1470 = vrot.lane.b32.xlu0 %v5900_v24, %s5599_s9 }
 0x391   : > { %1561 = vrot.lane.b32.xlu0 %v5942_v49, %s5599_s9 }
 0x394   : > { %v872_v26 = vpop.xlane.xlu1 %871 }
 0x395   : > { %v882_v28 = vsub.f32 %v5998_v15, %v872_v26 }
 0x397   : > { %v896_v29 = vmul.f32 1.442695, %v882_v28 }
 0x398   : > { %v5164_v15 = vpop.permute.xlu1 %5163 }
 0x399   : > { %5286 = vpow2.f32 %v896_v29  ;;  %v5166_v3 = vunpack.i.h.bf16 %v5164_v15  ;;  %v5165_v4 = vunpack.i.l.bf16 %v5164_v15 }
 0x39b   : > { %v4894_v7 = vpack.c.bf16 %v5166_v3, %v5165_v4 }
 0x3a3   : > { %v6050_v30 = vpop.eup %5286 }
 0x3a4   : > { %v918_v32 = vsel %vm851_vm5, %v6050_v30, 0.0 }
 0x3a5   : > { %919 = vadd.xlane.f32.xlu1 %v918_v32 }
 0x3b6   : > { %1381 = vrot.lane.b32.xlu1 %v5936_v47, %s5599_s9 }
 0x3ba   : > { %1472 = vrot.lane.b32.xlu1 %v5938_v48, %s5599_s9 }
 0x3be   : > { %1563 = vrot.lane.b32.xlu1 %v5950_v50, %s5599_s9 }
 0x3e7   : > { %v905_v35 = vpop.xlane.xlu0 %904 }
 0x3e8   : > { %5288 = vrcp.f32 %v905_v35  ;;  %v902_v36 = vpop.xlane.xlu1 %901 }
 0x3e9   : > { %5290 = vrcp.f32 %v902_v36 }
 0x3f0   : > { %v908_v37 = vpop.xlane.xlu1 %907 }
 0x3f1   : > { %5292 = vrcp.f32 %v908_v37 }
 0x3f2   : > { %v5289_v38 = vpop.eup %5288 }
 0x3f3   : > { %v5291_v40 = vpop.eup %5290  ;;  %v933_v53 = vmul.f32 %v5289_v38, %v6004_v39 }
 0x3f4   : > { %v911_v46 = vpop.xlane.xlu0 %910  ;;  %v932_v51 = vmul.f32 %v5291_v40, %v6006_v44 }
 0x3f5   : > { %5294 = vrcp.f32 %v911_v46  ;;  %v914_v52 = vpop.xlane.xlu1 %913 }
 0x3f6   : > { %5296 = vrcp.f32 %v914_v52  ;;  %4602 = vmatprep.mubr.msk.f32.mxu0 %vm851_vm5, %v932_v51 }
 0x3f7   : > { %4603 = vmatmul.mubr.msk.f32.vlgmr.msra.gmra.mrb[10].mxu0 %vm851_vm5, %v933_v53 }
 0x3f8   : > { %4877 = vmatpush3.bf16.msra.mxu0 %v6012_v62  ;;  %v917_v57 = vpop.xlane.xlu0 %916  ;;  %v4888_v62 = vpack.c.bf16 %v5161_v60, %v5160_v61 }
 0x3f9   : > { %5298 = vrcp.f32 %v917_v57  ;;  %4884 = vmatprep.subr.msk.bf16.mxu0 %vm5910_vm2, %v4882_v54 }
 0x3fb   : > { %v5293_v58 = vpop.eup %5292 }
 0x3fc   : > { %v923_v59 = vpop.xlane.xlu0 %922  ;;  %v934_v44 = vmul.f32 %v5293_v58, %v6016_v1 }
 0x3fd   : > { %5300 = vrcp.f32 %v923_v59 }
 0x3fe   : > { %4609 = vmatprep.mubr.msk.f32.mxu1 %vm851_vm5, %v934_v44 }
 0x3ff   : > { %v5295_v39 = vpop.eup %5294 }
 0x400   : > { %v5297_v63 = vpop.eup %5296  ;;  %v935_v0 = vmul.f32 %v5295_v39, %v6022_v10  ;;  %v1291_v5 = vpop.permute.xlu0 %1290 }
 0x401   : > { %v936_v2 = vmul.f32 %v5297_v63, %v6020_v9  ;;  %v1380_v10 = vpop.permute.xlu1 %1379 }
 0x402   : > { %4610 = vmatmul.mubr.msk.f32.vlgmr.msra.gmra.mrb[6].mxu1 %vm851_vm5, %v935_v0 }
 0x403   : > { %v5299_v6 = vpop.eup %5298  ;;  %4616 = vmatprep.mubr.msk.f32.mxu0 %vm851_vm5, %v936_v2  ;;  %4881 = vmatpush3.bf16.msra.mxu1 %v6028_v14 }
 0x404   : > { %4890 = vmatprep.subr.msk.bf16.mxu1 %vm5910_vm2, %v4888_v62  ;;  %v937_v1 = vmul.f32 %v5299_v6, %v6030_v18  ;;  %v5169_v8 = vpop.permute.xlu0 %5168 }
 0x405   : > { %v5171_v19 = vunpack.i.h.bf16 %v5169_v8  ;;  %v5170_v22 = vunpack.i.l.bf16 %v5169_v8 }
 0x406   : > { %4617 = vmatmul.mubr.msk.f32.vlgmr.msra.gmra.mrb[12].mxu0 %vm851_vm5, %v937_v1 }
 0x407   : > { %4887 = vmatpush3.bf16.xpose.msk.msra.mxu0 %vm5910_vm2, %v4882_v54  ;;  %4630 = vmatprep.mubr.msk.f32.mxu0 %vm480_vm1, %v1289_v34  ;;  %v5301_v14 = vpop.eup %5300  ;;  %v4900_v28 = vpack.c.bf16 %v5171_v19, %v5170_v22 }
 0x408   : > { %4896 = vmatprep.subr.msk.bf16.mxu0 %vm5910_vm2, %v4894_v7  ;;  %v1471_v9 = vpop.permute.xlu0 %1470  ;;  %v939_v26 = vmul.f32 %v5301_v14, %v6035_v21 }
 0x40c   : > { %v1562_v29 = vpop.permute.xlu0 %1561 }
 0x40e   : > { %4631 = vmatmul.mubr.msk.f32.vlgmr.msra.gmra.mrb[14].mxu0 %vm480_vm1, %v1291_v5 }
 0x40f   : > { %4899 = vmatpush3.bf16.xpose.msk.msra.mxu0 %vm5910_vm2, %v4894_v7  ;;  %4644 = vmatprep.mubr.msk.f32.mxu0 %vm480_vm1, %v1471_v9 }
 0x432   : > { %v920_v11 = vpop.xlane.xlu1 %919 }
 0x433   : > { %5302 = vrcp.f32 %v920_v11 }
 0x436   : > { %v1382_v12 = vpop.permute.xlu1 %1381 }
 0x43a   : > { %v1473_v13 = vpop.permute.xlu1 %1472 }
 0x43b   : > { %4645 = vmatmul.mubr.msk.f32.vlgmr.msra.gmra.mrb[16].mxu0 %vm480_vm1, %v1473_v13 }
 0x43d   : > { %v5303_v18 = vpop.eup %5302 }
 0x43e   : > { %v938_v25 = vmul.f32 %v5303_v18, %v6050_v30  ;;  %v1564_v21 = vpop.permute.xlu1 %1563 }
 0x440   : > { %4623 = vmatprep.mubr.msk.f32.mxu1 %vm851_vm5, %v938_v25 }
 0x441   : > { %4624 = vmatmul.mubr.msk.f32.vlgmr.msra.gmra.mrb[8].mxu1 %vm851_vm5, %v939_v26 }
 0x442   : > { %4893 = vmatpush3.bf16.xpose.msk.msra.mxu1 %vm5910_vm2, %v4888_v62  ;;  %4637 = vmatprep.mubr.msk.f32.mxu1 %vm480_vm1, %v1380_v10 }
 0x443   : > { %4902 = vmatprep.subr.msk.bf16.mxu1 %vm5910_vm2, %v4900_v28 }
 0x449   : > { %4638 = vmatmul.mubr.msk.f32.vlgmr.msra.gmra.mrb[10].mxu1 %vm480_vm1, %v1382_v12 }
 0x44a   : > { %4905 = vmatpush3.bf16.xpose.msk.msra.mxu1 %vm5910_vm2, %v4900_v28  ;;  %4651 = vmatprep.mubr.msk.f32.mxu1 %vm480_vm1, %v1562_v29 }
 0x451   : > { %4652 = vmatmul.mubr.msk.f32.vlgmr.msra.gmra.mrb[12].mxu1 %vm480_vm1, %v1564_v21 }
 0x4ca   : > { %v6102_v30 = vpop.f32.mrb[10].mxu0 }
 0x4cb   : > { %v6104_v32 = vpop.f32.mrb[11].mxu0 }
 0x4d5   : > { %v6106_v33 = vpop.f32.mrb[6].mxu1 }
 0x4d6   : > { %v6108_v34 = vpop.f32.mrb[7].mxu1 }
 0x4d9   : > { %v6110_v15 = vpop.f32.mrb[12].mxu0 }
 0x4da   : > { %v6112_v35 = vpop.f32.mrb[13].mxu0 }
 0x4e1   : > { %v4632_v36 = vpop.f32.mrb[14].mxu0 }
 0x4e2   : > { %v1653_v37 = vsel %vm5954_vm3, %v4632_v36, -1e+30  ;;  %v1370_v38 = vpop.f32.mrb[15].mxu0 }
 0x4e3   : > { %v1652_v40 = vsel %vm5958_vm4, %v1370_v38, -1e+30  ;;  %v1663_v43 = vsel %vm851_vm5, %v1653_v37, -inf }
 0x4e4   : > { %1664 = vmax.xlane.f32.xlu1 %v1663_v43  ;;  %v1660_v45 = vsel %vm851_vm5, %v1652_v40, -inf }
 0x4e5   : > { %1661 = vmax.xlane.f32.xlu0 %v1660_v45 }
 0x50e   : > { %v4646_v46 = vpop.f32.mrb[16].mxu0 }
 0x50f   : > { %v1552_v51 = vpop.f32.mrb[17].mxu0  ;;  %v1657_v63 = vsel %vm5954_vm3, %v4646_v46, -1e+30 }
 0x510   : > { %v6122_v52 = vsel %vm5958_vm4, %v1552_v51, -1e+30  ;;  %v1675_v62 = vsel %vm851_vm5, %v1657_v63, -inf }
 0x511   : > { %v1672_v53 = vsel %vm851_vm5, %v6122_v52, -inf }
 0x512   : > { %1673 = vmax.xlane.f32.xlu1 %v1672_v53 }
 0x514   : > { %v6126_v54 = vpop.f32.mrb[8].mxu1 }
 0x515   : > { %v6128_v57 = vpop.f32.mrb[9].mxu1 }
 0x51c   : > { %v4639_v58 = vpop.f32.mrb[10].mxu1 }
 0x51d   : > { %v1461_v59 = vpop.f32.mrb[11].mxu1  ;;  %v1655_v61 = vsel %vm5954_vm3, %v4639_v58, -1e+30 }
 0x51e   : > { %v1654_v44 = vsel %vm5958_vm4, %v1461_v59, -1e+30  ;;  %v1669_v39 = vsel %vm851_vm5, %v1655_v61, -inf }
 0x51f   : > { %v1666_v60 = vsel %vm851_vm5, %v1654_v44, -inf }
 0x520   : > { %1667 = vmax.xlane.f32.xlu0 %v1666_v60 }
 0x523   : > { %5173 = vrot.lane.b32.xlu1 %v5888_v16, %s5600_s26 }
 0x524   : > { %1670 = vmax.xlane.f32.xlu0 %v1669_v39  ;;  %v4653_v0 = vpop.f32.mrb[12].mxu1 }
 0x525   : > { %v1643_v2 = vpop.f32.mrb[13].mxu1  ;;  %v1659_v3 = vsel %vm5954_vm3, %v4653_v0, -1e+30 }
 0x526   : > { %v1681_v4 = vsel %vm851_vm5, %v1659_v3, -inf  ;;  %v6154_v5 = vsel %vm5958_vm4, %v1643_v2, -1e+30 }
 0x527   : > { %5183 = vrot.lane.b32.xlu1 %v5898_v23, %s5600_s26  ;;  %v1678_v6 = vsel %vm851_vm5, %v6154_v5, -inf }
 0x528   : > { %1676 = vmax.xlane.f32.xlu0 %v1675_v62 }
 0x52b   : > { %5188 = vrot.lane.b32.xlu1 %v5905_v27, %s5600_s26 }
 0x52c   : > { %1682 = vmax.xlane.f32.xlu0 %v1681_v4 }
 0x52f   : > { %5198 = vrot.lane.b32.xlu1 %v5895_v20, %s5601_s10 }
 0x542   : > { %5178 = vrot.lane.b32.xlu0 %v5895_v20, %s5600_s26 }
 0x546   : > { %5193 = vrot.lane.b32.xlu0 %v5888_v16, %s5601_s10 }
 0x54a   : > { %2096 = vrot.lane.b32.xlu0 %v5890_v17, %s5602_s8 }
 0x553   : > { %1679 = vmax.xlane.f32.xlu1 %v1678_v6 }
 0x564   : > { %5203 = vrot.lane.b32.xlu1 %v5898_v23, %s5601_s10 }
 0x571   : > { %v1665_v1 = vpop.xlane.xlu1 %1664 }
 0x572   : > { %v1685_v7 = vsub.f32 %v1653_v37, %v1665_v1  ;;  %v1662_v8 = vpop.xlane.xlu0 %1661 }
 0x573   : > { %v1684_v9 = vsub.f32 %v1652_v40, %v1662_v8 }
 0x574   : > { %v1694_v10 = vmul.f32 1.442695, %v1685_v7 }
 0x575   : > { %v1692_v11 = vmul.f32 1.442695, %v1684_v9 }
 0x576   : > { %5304 = vpow2.f32 %v1694_v10 }
 0x577   : > { %5306 = vpow2.f32 %v1692_v11 }
 0x580   : > { %v6160_v12 = vpop.eup %5304 }
 0x581   : > { %v1711_v13 = vsel %vm851_vm5, %v6160_v12, 0.0  ;;  %v6164_v14 = vpop.eup %5306 }
 0x582   : > { %1712 = vadd.xlane.f32.xlu0 %v1711_v13  ;;  %v1708_v18 = vsel %vm851_vm5, %v6164_v14, 0.0 }
 0x588   : > { %1709 = vadd.xlane.f32.xlu1 %v1708_v18 }
 0x59f   : > { %v1674_v19 = vpop.xlane.xlu1 %1673 }
 0x5a0   : > { %v1688_v38 = vsub.f32 %v6122_v52, %v1674_v19 }
 0x5a2   : > { %v1700_v46 = vmul.f32 1.442695, %v1688_v38 }
 0x5a3   : > { %v5174_v22 = vpop.permute.xlu1 %5173 }
 0x5a4   : > { %v5176_v25 = vunpack.i.h.bf16 %v5174_v22  ;;  %v5175_v26 = vunpack.i.l.bf16 %v5174_v22 }
 0x5a6   : > { %v4906_v28 = vpack.c.bf16 %v5176_v25, %v5175_v26 }
 0x5a7   : > { %v5184_v29 = vpop.permute.xlu1 %5183 }
 0x5a8   : > { %v5186_v21 = vunpack.i.h.bf16 %v5184_v29  ;;  %v5185_v36 = vunpack.i.l.bf16 %v5184_v29  ;;  %4907 = vmatprep.subr.bf16.mxu0 %v4906_v28 }
 0x5a9   : > { %4909 = vmatpush3.bf16.msra.mxu0 %v4906_v28 }
 0x5aa   : > { %v6168_v37 = vpack.c.bf16 %v5186_v21, %v5185_v36 }
 0x5ab   : > { %v5189_v2 = vpop.permute.xlu1 %5188 }
 0x5ac   : > { %4915 = vmatprep.subr.bf16.mxu0 %v6168_v37  ;;  %v5191_v6 = vunpack.i.h.bf16 %v5189_v2  ;;  %v5190_v7 = vunpack.i.l.bf16 %v5189_v2 }
 0x5ad   : > { %v1668_v40 = vpop.xlane.xlu0 %1667 }
 0x5ae   : > { %v1686_v43 = vsub.f32 %v1654_v44, %v1668_v40  ;;  %v6184_v13 = vpack.c.bf16 %v5191_v6, %v5190_v7 }
 0x5af   : > { %v5199_v26 = vpop.permute.xlu1 %5198 }
 0x5b0   : > { %v1696_v45 = vmul.f32 1.442695, %v1686_v43  ;;  %v5200_v7 = vunpack.i.l.bf16 %v5199_v26 }
 0x5b1   : > { %v1671_v51 = vpop.xlane.xlu0 %1670 }
 0x5b2   : > { %5308 = vpow2.f32 %v1696_v45  ;;  %v1687_v53 = vsub.f32 %v1655_v61, %v1671_v51 }
 0x5b3   : > { %5310 = vpow2.f32 %v1700_v46 }
 0x5b4   : > { %v1698_v58 = vmul.f32 1.442695, %v1687_v53 }
 0x5b5   : > { %v1677_v59 = vpop.xlane.xlu0 %1676 }
 0x5b6   : > { %5312 = vpow2.f32 %v1698_v58  ;;  %v1689_v60 = vsub.f32 %v1657_v63, %v1677_v59 }
 0x5b8   : > { %v1702_v39 = vmul.f32 1.442695, %v1689_v60 }
 0x5b9   : > { %v1683_v0 = vpop.xlane.xlu0 %1682 }
 0x5ba   : > { %5314 = vpow2.f32 %v1702_v39  ;;  %v1691_v62 = vsub.f32 %v1659_v3, %v1683_v0 }
 0x5bc   : > { %v6172_v4 = vpop.eup %5308  ;;  %v1706_v52 = vmul.f32 1.442695, %v1691_v62 }
 0x5bd   : > { %v5179_v44 = vpop.permute.xlu0 %5178  ;;  %v1714_v1 = vsel %vm851_vm5, %v6172_v4, 0.0  ;;  %v6176_v9 = vpop.eup %5310 }
 0x5be   : > { %5316 = vpow2.f32 %v1706_v52  ;;  %v5181_v61 = vunpack.i.h.bf16 %v5179_v44  ;;  %v5180_v8 = vunpack.i.l.bf16 %v5179_v44  ;;  %1715 = vadd.xlane.f32.xlu1 %v1714_v1  ;;  %v1720_v11 = vsel %vm851_vm5, %v6176_v9, 0.0 }
 0x5bf   : > { %v5201_v1 = vunpack.i.h.bf16 %v5199_v26 }
 0x5c0   : > { %v6178_v63 = vpop.eup %5312  ;;  %v4910_v10 = vpack.c.bf16 %v5181_v61, %v5180_v8 }
 0x5c1   : > { %v1717_v3 = vsel %vm851_vm5, %v6178_v63, 0.0  ;;  %v5194_v40 = vpop.permute.xlu0 %5193 }
 0x5c2   : > { %1718 = vadd.xlane.f32.xlu0 %v1717_v3  ;;  %4911 = vmatprep.subr.bf16.mxu1 %v4910_v10  ;;  %v5196_v58 = vunpack.i.h.bf16 %v5194_v40  ;;  %v5195_v59 = vunpack.i.l.bf16 %v5194_v40  ;;  %v4928_v3 = vpack.c.bf16 %v5201_v1, %v5200_v7 }
 0x5c3   : > { %1721 = vadd.xlane.f32.xlu1 %v1720_v11  ;;  %4913 = vmatpush3.bf16.msra.mxu1 %v4910_v10 }
 0x5c4   : > { %v6186_v18 = vpop.eup %5314  ;;  %4919 = vmatprep.subr.bf16.mxu1 %v6184_v13  ;;  %v4922_v0 = vpack.c.bf16 %v5196_v58, %v5195_v59 }
 0x5c5   : > { %v1723_v19 = vsel %vm851_vm5, %v6186_v18, 0.0 }
 0x5c6   : > { %1724 = vadd.xlane.f32.xlu0 %v1723_v19 }
 0x5c8   : > { %v6191_v22 = vpop.eup %5316 }
 0x5c9   : > { %v1729_v25 = vsel %vm851_vm5, %v6191_v22, 0.0 }
 0x5ca   : > { %1730 = vadd.xlane.f32.xlu0 %v1729_v25 }
 0x5d4   : > { %2187 = vrot.lane.b32.xlu1 %v5922_v42, %s5602_s8 }
 0x5e0   : > { %2098 = vrot.lane.b32.xlu0 %v5920_v41, %s5602_s8  ;;  %v1680_v28 = vpop.xlane.xlu1 %1679 }
 0x5e1   : > { %v1690_v29 = vsub.f32 %v6154_v5, %v1680_v28  ;;  %v2097_v5 = vpop.permute.xlu0 %2096 }
 0x5e3   : > { %v1704_v21 = vmul.f32 1.442695, %v1690_v29 }
 0x5e4   : > { %5208 = vrot.lane.b32.xlu0 %v5905_v27, %s5601_s10  ;;  %v5204_v43 = vpop.permute.xlu1 %5203  ;;  %s314_s10 = scalar_lea.vmem [#allocation10], %s4249_s19 }
 0x5e5   : > { %5318 = vpow2.f32 %v1704_v21  ;;  %v5206_v11 = vunpack.i.h.bf16 %v5204_v43  ;;  %v5205_v19 = vunpack.i.l.bf16 %v5204_v43 }
 0x5e7   : > { %v4934_v26 = vpack.c.bf16 %v5206_v11, %v5205_v19 }
 0x5e8   : > { %2278 = vrot.lane.b32.xlu0 %v5900_v24, %s5602_s8 }
 0x5ec   : > { %2369 = vrot.lane.b32.xlu0 %v5942_v49, %s5602_s8 }
 0x5ef   : > { %v6206_v36 = vpop.eup %5318 }
 0x5f0   : > { %v1726_v38 = vsel %vm851_vm5, %v6206_v36, 0.0 }
 0x5f8   : > { %1727 = vadd.xlane.f32.xlu1 %v1726_v38 }
 0x609   : > { %2189 = vrot.lane.b32.xlu1 %v5936_v47, %s5602_s8 }
 0x60d   : > { %2280 = vrot.lane.b32.xlu1 %v5938_v48, %s5602_s8 }
 0x60f   : > { %v1713_v45 = vpop.xlane.xlu0 %1712 }
 0x610   : > { %5320 = vrcp.f32 %v1713_v45 }
 0x611   : > { %2371 = vrot.lane.b32.xlu1 %v5950_v50, %s5602_s8  ;;  %s4136_s8 = sshll.u32 %s314_s10, 4  ;;  %s6613_s8 = int_to_ptr.vmem [resolvable:$true] %s4136_s8 }
 0x615   : > { %v1710_v46 = vpop.xlane.xlu1 %1709 }
 0x616   : > { %5322 = vrcp.f32 %v1710_v46 }
 0x61a   : > { %v5321_v51 = vpop.eup %5320 }
 0x61b   : > { %v1741_v39 = vmul.f32 %v5321_v51, %v6160_v12 }
 0x620   : > { %v5323_v53 = vpop.eup %5322 }
 0x621   : > { %v1740_v60 = vmul.f32 %v5323_v53, %v6164_v14 }
 0x623   : > { %4658 = vmatprep.mubr.msk.f32.mxu0 %vm851_vm5, %v1740_v60 }
 0x624   : > { %4659 = vmatmul.mubr.msk.f32.vlgmr.msra.gmra.mrb[18].mxu0 %vm851_vm5, %v1741_v39 }
 0x625   : > { %4917 = vmatpush3.bf16.msra.mxu0 %v6168_v37 }
 0x626   : > { %4924 = vmatprep.subr.msk.bf16.mxu0 %vm5910_vm2, %v4922_v0 }
 0x64b   : > { %v1716_v2 = vpop.xlane.xlu1 %1715 }
 0x64c   : > { %5324 = vrcp.f32 %v1716_v2 }
 0x64f   : > { %v1719_v62 = vpop.xlane.xlu0 %1718 }
 0x650   : > { %5326 = vrcp.f32 %v1719_v62  ;;  %v1722_v52 = vpop.xlane.xlu1 %1721 }
 0x651   : > { %5328 = vrcp.f32 %v1722_v52 }
 0x653   : > { %v1725_v6 = vpop.xlane.xlu0 %1724 }
 0x654   : > { %5330 = vrcp.f32 %v1725_v6 }
 0x656   : > { %v5325_v14 = vpop.eup %5324 }
 0x657   : > { %v1731_v12 = vpop.xlane.xlu0 %1730  ;;  %v1742_v44 = vmul.f32 %v5325_v14, %v6172_v4 }
 0x658   : > { %5332 = vrcp.f32 %v1731_v12 }
 0x659   : > { %4665 = vmatprep.mubr.msk.f32.mxu1 %vm851_vm5, %v1742_v44 }
 0x65a   : > { %v5327_v37 = vpop.eup %5326 }
 0x65b   : > { %v5329_v61 = vpop.eup %5328  ;;  %v1743_v8 = vmul.f32 %v5327_v37, %v6178_v63  ;;  %v2099_v25 = vpop.permute.xlu0 %2098 }
 0x65c   : > { %v1744_v10 = vmul.f32 %v5329_v61, %v6176_v9 }
 0x65d   : > { %4666 = vmatmul.mubr.msk.f32.vlgmr.msra.gmra.mrb[14].mxu1 %vm851_vm5, %v1743_v8 }
 0x65e   : > { %v5331_v28 = vpop.eup %5330  ;;  %4672 = vmatprep.mubr.msk.f32.mxu0 %vm851_vm5, %v1744_v10  ;;  %4921 = vmatpush3.bf16.msra.mxu1 %v6184_v13  ;;  %v2188_v13 = vpop.permute.xlu1 %2187 }
 0x65f   : > { %v1745_v4 = vmul.f32 %v5331_v28, %v6186_v18  ;;  %4930 = vmatprep.subr.msk.bf16.mxu1 %vm5910_vm2, %v4928_v3  ;;  %v5209_v9 = vpop.permute.xlu0 %5208 }
 0x660   : > { %v5210_v43 = vunpack.i.l.bf16 %v5209_v9 }
 0x661   : > { %4673 = vmatmul.mubr.msk.f32.vlgmr.msra.gmra.mrb[20].mxu0 %vm851_vm5, %v1745_v4 }
 0x662   : > { %4927 = vmatpush3.bf16.xpose.msk.msra.mxu0 %vm5910_vm2, %v4922_v0  ;;  %4686 = vmatprep.mubr.msk.f32.mxu0 %vm480_vm1, %v2097_v5  ;;  %v5333_v38 = vpop.eup %5332  ;;  %v5211_v5 = vunpack.i.h.bf16 %v5209_v9 }
 0x663   : > { %4936 = vmatprep.subr.msk.bf16.mxu0 %vm5910_vm2, %v4934_v26  ;;  %v2279_v63 = vpop.permute.xlu0 %2278  ;;  %v1747_v46 = vmul.f32 %v5333_v38, %v6191_v22 }
 0x664   : > { %v4940_v51 = vpack.c.bf16 %v5211_v5, %v5210_v43 }
 0x667   : > { %v2370_v53 = vpop.permute.xlu0 %2369 }
 0x669   : > { %4687 = vmatmul.mubr.msk.f32.vlgmr.msra.gmra.mrb[22].mxu0 %vm480_vm1, %v2099_v25 }
 0x66a   : > { %4939 = vmatpush3.bf16.xpose.msk.msra.mxu0 %vm5910_vm2, %v4934_v26  ;;  %4700 = vmatprep.mubr.msk.f32.mxu0 %vm480_vm1, %v2279_v63 }
 0x685   : > { %v1728_v18 = vpop.xlane.xlu1 %1727 }
 0x686   : > { %5334 = vrcp.f32 %v1728_v18 }
 0x689   : > { %v2190_v29 = vpop.permute.xlu1 %2189 }
 0x68d   : > { %v2281_v21 = vpop.permute.xlu1 %2280 }
 0x68e   : > { %4701 = vmatmul.mubr.msk.f32.vlgmr.msra.gmra.mrb[24].mxu0 %vm480_vm1, %v2281_v21 }
 0x690   : > { %v5335_v40 = vpop.eup %5334 }
 0x691   : > { %v1746_v45 = vmul.f32 %v5335_v40, %v6206_v36  ;;  %v2372_v22 = vpop.permute.xlu1 %2371 }
 0x693   : > { %4679 = vmatprep.mubr.msk.f32.mxu1 %vm851_vm5, %v1746_v45 }
 0x694   : > { %4680 = vmatmul.mubr.msk.f32.vlgmr.msra.gmra.mrb[16].mxu1 %vm851_vm5, %v1747_v46 }
 0x695   : > { %4933 = vmatpush3.bf16.xpose.msk.msra.mxu1 %vm5910_vm2, %v4928_v3  ;;  %4693 = vmatprep.mubr.msk.f32.mxu1 %vm480_vm1, %v2188_v13 }
 0x696   : > { %4942 = vmatprep.subr.msk.bf16.mxu1 %vm5910_vm2, %v4940_v51 }
 0x69c   : > { %4694 = vmatmul.mubr.msk.f32.vlgmr.msra.gmra.mrb[18].mxu1 %vm480_vm1, %v2190_v29 }
 0x69d   : > { %4945 = vmatpush3.bf16.xpose.msk.msra.mxu1 %vm5910_vm2, %v4940_v51  ;;  %4707 = vmatprep.mubr.msk.f32.mxu1 %vm480_vm1, %v2370_v53 }
 0x6a4   : > { %4708 = vmatmul.mubr.msk.f32.vlgmr.msra.gmra.mrb[20].mxu1 %vm480_vm1, %v2372_v22 }
 0x6f7   : > { %v6258_v36 = vpop.f32.mrb[18].mxu0 }
 0x6f8   : > { %v6260_v58 = vpop.f32.mrb[19].mxu0 }
 0x730   : > { %v6262_v59 = vpop.f32.mrb[14].mxu1 }
 0x731   : > { %v6264_v60 = vpop.f32.mrb[15].mxu1 }
 0x734   : > { %v6266_v39 = vpop.f32.mrb[20].mxu0 }
 0x735   : > { %v6268_v0 = vpop.f32.mrb[21].mxu0 }
 0x73c   : > { %v4688_v2 = vpop.f32.mrb[22].mxu0 }
 0x73d   : > { %v2461_v62 = vsel %vm5954_vm3, %v4688_v2, -1e+30  ;;  %v2178_v52 = vpop.f32.mrb[23].mxu0 }
 0x73e   : > { %v2460_v6 = vsel %vm5958_vm4, %v2178_v52, -1e+30  ;;  %v2471_v14 = vsel %vm851_vm5, %v2461_v62, -inf }
 0x73f   : > { %2472 = vmax.xlane.f32.xlu1 %v2471_v14  ;;  %v2468_v12 = vsel %vm851_vm5, %v2460_v6, -inf }
 0x740   : > { %2469 = vmax.xlane.f32.xlu0 %v2468_v12 }
 0x761   : > { %v4702_v44 = vpop.f32.mrb[24].mxu0 }
 0x762   : > { %v2360_v1 = vpop.f32.mrb[25].mxu0  ;;  %v2465_v4 = vsel %vm5954_vm3, %v4702_v44, -1e+30 }
 0x763   : > { %v6278_v7 = vsel %vm5958_vm4, %v2360_v1, -1e+30  ;;  %v2483_v63 = vsel %vm851_vm5, %v2465_v4, -inf }
 0x764   : > { %v2480_v37 = vsel %vm851_vm5, %v6278_v7, -inf }
 0x765   : > { %2481 = vmax.xlane.f32.xlu1 %v2480_v37 }
 0x767   : > { %v6282_v61 = vpop.f32.mrb[16].mxu1 }
 0x768   : > { %v6284_v8 = vpop.f32.mrb[17].mxu1 }
 0x76f   : > { %v4695_v10 = vpop.f32.mrb[18].mxu1 }
 0x770   : > { %v2269_v3 = vpop.f32.mrb[19].mxu1  ;;  %v2463_v25 = vsel %vm5954_vm3, %v4695_v10, -1e+30 }
 0x771   : > { %v2462_v11 = vsel %vm5958_vm4, %v2269_v3, -1e+30  ;;  %v2477_v28 = vsel %vm851_vm5, %v2463_v25, -inf }
 0x772   : > { %v2474_v19 = vsel %vm851_vm5, %v2462_v11, -inf }
 0x773   : > { %2475 = vmax.xlane.f32.xlu0 %v2474_v19 }
 0x776   : > { %5213 = vrot.lane.b32.xlu1 %v5888_v16, %s5603_s16 }
 0x777   : > { %v4709_v26 = vpop.f32.mrb[20].mxu1  ;;  %2478 = vmax.xlane.f32.xlu0 %v2477_v28 }
 0x778   : > { %v2451_v9 = vpop.f32.mrb[21].mxu1  ;;  %v2467_v13 = vsel %vm5954_vm3, %v4709_v26, -1e+30 }
 0x779   : > { %v2489_v18 = vsel %vm851_vm5, %v2467_v13, -inf  ;;  %v6310_v29 = vsel %vm5958_vm4, %v2451_v9, -1e+30 }
 0x77a   : > { %5223 = vrot.lane.b32.xlu1 %v5898_v23, %s5603_s16  ;;  %v2486_v21 = vsel %vm851_vm5, %v6310_v29, -inf }
 0x77b   : > { %2484 = vmax.xlane.f32.xlu0 %v2483_v63 }
 0x77e   : > { %5228 = vrot.lane.b32.xlu1 %v5905_v27, %s5603_s16 }
 0x77f   : > { %2490 = vmax.xlane.f32.xlu0 %v2489_v18 }
 0x782   : > { %5238 = vrot.lane.b32.xlu1 %v5895_v20, %s5604_s17 }
 0x795   : > { %5218 = vrot.lane.b32.xlu0 %v5895_v20, %s5603_s16  ;;  %s4385_s16 = sshll.u32 %s5668_s25, 10  ;;  %s5610_s25 = smov [#allocation10]  }
 0x799   : > { %5233 = vrot.lane.b32.xlu0 %v5888_v16, %s5604_s17 }
 0x79d   : > { %5243 = vrot.lane.b32.xlu0 %v5898_v23, %s5604_s17 }
 0x7a6   : > { %2487 = vmax.xlane.f32.xlu1 %v2486_v21 }
 0x7b7   : > { %2904 = vrot.lane.b32.xlu1 %v5890_v17, %s5605_s12 }
 0x7cc   : > { %v2473_v38 = vpop.xlane.xlu1 %2472 }
 0x7cd   : > { %v2493_v40 = vsub.f32 %v2461_v62, %v2473_v38  ;;  %v2470_v5 = vpop.xlane.xlu0 %2469 }
 0x7ce   : > { %v2492_v43 = vsub.f32 %v2460_v6, %v2470_v5 }
 0x7cf   : > { %v2502_v45 = vmul.f32 1.442695, %v2493_v40 }
 0x7d0   : > { %v2500_v46 = vmul.f32 1.442695, %v2492_v43 }
 0x7d1   : > { %5336 = vpow2.f32 %v2502_v45 }
 0x7d2   : > { %5338 = vpow2.f32 %v2500_v46 }
 0x7db   : > { %v6316_v51 = vpop.eup %5336 }
 0x7dc   : > { %v6318_v53 = vpop.eup %5338  ;;  %v2519_v22 = vsel %vm851_vm5, %v6316_v51, 0.0 }
 0x7dd   : > { %2520 = vadd.xlane.f32.xlu0 %v2519_v22  ;;  %v2516_v2 = vsel %vm851_vm5, %v6318_v53, 0.0 }
 0x7de   : > { %2517 = vadd.xlane.f32.xlu1 %v2516_v2 }
 0x7f2   : > { %v2482_v17 = vpop.xlane.xlu1 %2481 }
 0x7f3   : > { %v2496_v10 = vsub.f32 %v6278_v7, %v2482_v17 }
 0x7f5   : > { %v2508_v26 = vmul.f32 1.442695, %v2496_v10 }
 0x7f6   : > { %v5214_v62 = vpop.permute.xlu1 %5213 }
 0x7f7   : > { %v5216_v52 = vunpack.i.h.bf16 %v5214_v62  ;;  %v5215_v6 = vunpack.i.l.bf16 %v5214_v62 }
 0x7f9   : > { %v4946_v14 = vpack.c.bf16 %v5216_v52, %v5215_v6 }
 0x7fa   : > { %v5224_v12 = vpop.permute.xlu1 %5223 }
 0x7fb   : > { %v5226_v44 = vunpack.i.h.bf16 %v5224_v12  ;;  %v5225_v1 = vunpack.i.l.bf16 %v5224_v12  ;;  %4947 = vmatprep.subr.bf16.mxu0 %v4946_v14 }
 0x7fc   : > { %4949 = vmatpush3.bf16.msra.mxu0 %v4946_v14 }
 0x7fd   : > { %v6324_v37 = vpack.c.bf16 %v5226_v44, %v5225_v1 }
 0x7fe   : > { %v5229_v43 = vpop.permute.xlu1 %5228 }
 0x7ff   : > { %4955 = vmatprep.subr.bf16.mxu0 %v6324_v37  ;;  %v5231_v22 = vunpack.i.h.bf16 %v5229_v43  ;;  %v5230_v17 = vunpack.i.l.bf16 %v5229_v43 }
 0x800   : > { %v2476_v3 = vpop.xlane.xlu0 %2475 }
 0x801   : > { %v2494_v19 = vsub.f32 %v2462_v11, %v2476_v3  ;;  %v6338_v14 = vpack.c.bf16 %v5231_v22, %v5230_v17 }
 0x803   : > { %v2504_v28 = vmul.f32 1.442695, %v2494_v19  ;;  %v5239_v19 = vpop.permute.xlu1 %5238 }
 0x804   : > { %v2479_v9 = vpop.xlane.xlu0 %2478  ;;  %v5240_v17 = vunpack.i.l.bf16 %v5239_v19 }
 0x805   : > { %5340 = vpow2.f32 %v2504_v28  ;;  %v2495_v63 = vsub.f32 %v2463_v25, %v2479_v9 }
 0x806   : > { %5342 = vpow2.f32 %v2508_v26 }
 0x807   : > { %v2506_v18 = vmul.f32 1.442695, %v2495_v63 }
 0x808   : > { %v2485_v21 = vpop.xlane.xlu0 %2484 }
 0x809   : > { %5344 = vpow2.f32 %v2506_v18  ;;  %v2497_v38 = vsub.f32 %v2465_v4, %v2485_v21 }
 0x80b   : > { %v2510_v40 = vmul.f32 1.442695, %v2497_v38 }
 0x80c   : > { %v2491_v5 = vpop.xlane.xlu0 %2490 }
 0x80d   : > { %5346 = vpow2.f32 %v2510_v40  ;;  %v2499_v45 = vsub.f32 %v2467_v13, %v2491_v5 }
 0x80f   : > { %v6328_v46 = vpop.eup %5340  ;;  %v2514_v7 = vmul.f32 1.442695, %v2499_v45 }
 0x810   : > { %v5219_v11 = vpop.permute.xlu0 %5218  ;;  %v2522_v2 = vsel %vm851_vm5, %v6328_v46, 0.0  ;;  %v6332_v52 = vpop.eup %5342 }
 0x811   : > { %5348 = vpow2.f32 %v2514_v7  ;;  %v5221_v25 = vunpack.i.h.bf16 %v5219_v11  ;;  %v5220_v62 = vunpack.i.l.bf16 %v5219_v11  ;;  %2523 = vadd.xlane.f32.xlu1 %v2522_v2  ;;  %v2528_v12 = vsel %vm851_vm5, %v6332_v52, 0.0 }
 0x812   : > { %v5241_v2 = vunpack.i.h.bf16 %v5239_v19 }
 0x813   : > { %v6334_v4 = vpop.eup %5344  ;;  %v4950_v6 = vpack.c.bf16 %v5221_v25, %v5220_v62 }
 0x814   : > { %v2525_v13 = vsel %vm851_vm5, %v6334_v4, 0.0 }
 0x815   : > { %2526 = vadd.xlane.f32.xlu0 %v2525_v13  ;;  %4951 = vmatprep.subr.bf16.mxu1 %v4950_v6  ;;  %v4968_v13 = vpack.c.bf16 %v5241_v2, %v5240_v17 }
 0x816   : > { %2529 = vadd.xlane.f32.xlu1 %v2528_v12  ;;  %4953 = vmatpush3.bf16.msra.mxu1 %v4950_v6 }
 0x817   : > { %v6342_v44 = vpop.eup %5346  ;;  %4959 = vmatprep.subr.bf16.mxu1 %v6338_v14 }
 0x818   : > { %v2531_v1 = vsel %vm851_vm5, %v6342_v44, 0.0 }
 0x819   : > { %2532 = vadd.xlane.f32.xlu0 %v2531_v1 }
 0x81b   : > { %v6347_v10 = vpop.eup %5348 }
 0x81c   : > { %v2537_v3 = vsel %vm851_vm5, %v6347_v10, 0.0 }
 0x81d   : > { %2538 = vadd.xlane.f32.xlu0 %v2537_v3 }
 0x827   : > { %5248 = vrot.lane.b32.xlu1 %v5905_v27, %s5604_s17 }
 0x833   : > { %2906 = vrot.lane.b32.xlu0 %v5920_v41, %s5605_s12  ;;  %v2488_v28 = vpop.xlane.xlu1 %2487  ;;  %v5234_v41 = vpop.permute.xlu0 %5233 }
 0x834   : > { %v2498_v26 = vsub.f32 %v6310_v29, %v2488_v28  ;;  %v5236_v40 = vunpack.i.h.bf16 %v5234_v41  ;;  %v5235_v5 = vunpack.i.l.bf16 %v5234_v41 }
 0x836   : > { %v2512_v9 = vmul.f32 1.442695, %v2498_v26 }
 0x837   : > { %2995 = vrot.lane.b32.xlu0 %v5922_v42, %s5605_s12  ;;  %v2905_v42 = vpop.permute.xlu1 %2904 }
 0x838   : > { %5350 = vpow2.f32 %v2512_v9 }
 0x83b   : > { %3086 = vrot.lane.b32.xlu0 %v5900_v24, %s5605_s12  ;;  %v5244_v24 = vpop.permute.xlu0 %5243 }
 0x83c   : > { %v5246_v12 = vunpack.i.h.bf16 %v5244_v24  ;;  %v5245_v1 = vunpack.i.l.bf16 %v5244_v24 }
 0x83e   : > { %v4974_v19 = vpack.c.bf16 %v5246_v12, %v5245_v1 }
 0x83f   : > { %3177 = vrot.lane.b32.xlu0 %v5942_v49, %s5605_s12 }
 0x842   : > { %v6362_v63 = vpop.eup %5350 }
 0x843   : > { %v2534_v18 = vsel %vm851_vm5, %v6362_v63, 0.0 }
 0x84b   : > { %2535 = vadd.xlane.f32.xlu1 %v2534_v18 }
 0x85c   : > { %2997 = vrot.lane.b32.xlu1 %v5936_v47, %s5605_s12 }
 0x860   : > { %3088 = vrot.lane.b32.xlu1 %v5938_v48, %s5605_s12  ;;  %v4962_v48 = vpack.c.bf16 %v5236_v40, %v5235_v5 }
 0x864   : > { %3179 = vrot.lane.b32.xlu1 %v5950_v50, %s5605_s12  ;;  %s6618_s12 = scalar_lea.hbm %s6669_s6, %s4385_s16 }
 0x86a   : > { %v2521_v29 = vpop.xlane.xlu0 %2520 }
 0x86b   : > { %5352 = vrcp.f32 %v2521_v29  ;;  %v2518_v49 = vpop.xlane.xlu1 %2517 }
 0x86c   : > { %5354 = vrcp.f32 %v2518_v49 }
 0x875   : > { %v5353_v21 = vpop.eup %5352 }
 0x876   : > { %v5355_v38 = vpop.eup %5354  ;;  %v2549_v47 = vmul.f32 %v5353_v21, %v6316_v51 }
 0x877   : > { %v2548_v43 = vmul.f32 %v5355_v38, %v6318_v53 }
 0x879   : > { %4714 = vmatprep.mubr.msk.f32.mxu0 %vm851_vm5, %v2548_v43 }
 0x87a   : > { %4715 = vmatmul.mubr.msk.f32.vlgmr.msra.gmra.mrb[26].mxu0 %vm851_vm5, %v2549_v47 }
 0x87b   : > { %4957 = vmatpush3.bf16.msra.mxu0 %v6324_v37 }
 0x87c   : > { %4964 = vmatprep.subr.msk.bf16.mxu0 %vm5910_vm2, %v4962_v48 }
 0x89e   : > { %v2524_v50 = vpop.xlane.xlu1 %2523 }
 0x89f   : > { %5356 = vrcp.f32 %v2524_v50 }
 0x8a2   : > { %v2527_v45 = vpop.xlane.xlu0 %2526 }
 0x8a3   : > { %5358 = vrcp.f32 %v2527_v45  ;;  %v2530_v7 = vpop.xlane.xlu1 %2529 }
 0x8a4   : > { %5360 = vrcp.f32 %v2530_v7 }
 0x8a6   : > { %v2533_v22 = vpop.xlane.xlu0 %2532 }
 0x8a7   : > { %5362 = vrcp.f32 %v2533_v22 }
 0x8a9   : > { %v5357_v53 = vpop.eup %5356 }
 0x8aa   : > { %v2539_v51 = vpop.xlane.xlu0 %2538  ;;  %v2550_v11 = vmul.f32 %v5357_v53, %v6328_v46 }
 0x8ab   : > { %5364 = vrcp.f32 %v2539_v51 }
 0x8ac   : > { %4721 = vmatprep.mubr.msk.f32.mxu1 %vm851_vm5, %v2550_v11 }
 0x8ad   : > { %v5359_v37 = vpop.eup %5358 }
 0x8ae   : > { %v5361_v25 = vpop.eup %5360  ;;  %v2551_v62 = vmul.f32 %v5359_v37, %v6334_v4  ;;  %v2907_v3 = vpop.permute.xlu0 %2906 }
 0x8af   : > { %v2552_v6 = vmul.f32 %v5361_v25, %v6332_v52 }
 0x8b0   : > { %4722 = vmatmul.mubr.msk.f32.vlgmr.msra.gmra.mrb[22].mxu1 %vm851_vm5, %v2551_v62 }
 0x8b1   : > { %v5363_v28 = vpop.eup %5362  ;;  %4728 = vmatprep.mubr.msk.f32.mxu0 %vm851_vm5, %v2552_v6  ;;  %4961 = vmatpush3.bf16.msra.mxu1 %v6338_v14  ;;  %v5249_v14 = vpop.permute.xlu1 %5248 }
 0x8b2   : > { %v2553_v46 = vmul.f32 %v5363_v28, %v6342_v44  ;;  %4970 = vmatprep.subr.msk.bf16.mxu1 %vm5910_vm2, %v4968_v13  ;;  %v2996_v52 = vpop.permute.xlu0 %2995  ;;  %v5251_v24 = vunpack.i.h.bf16 %v5249_v14 }
 0x8b4   : > { %4729 = vmatmul.mubr.msk.f32.vlgmr.msra.gmra.mrb[28].mxu0 %vm851_vm5, %v2553_v46 }
 0x8b5   : > { %4967 = vmatpush3.bf16.xpose.msk.msra.mxu0 %vm5910_vm2, %v4962_v48  ;;  %4742 = vmatprep.mubr.msk.f32.mxu0 %vm480_vm1, %v2905_v42  ;;  %v5365_v18 = vpop.eup %5364  ;;  %v5250_v42 = vunpack.i.l.bf16 %v5249_v14 }
 0x8b6   : > { %4976 = vmatprep.subr.msk.bf16.mxu0 %vm5910_vm2, %v4974_v19  ;;  %v3087_v4 = vpop.permute.xlu0 %3086  ;;  %v2555_v49 = vmul.f32 %v5365_v18, %v6347_v10 }
 0x8b7   : > { %v4980_v21 = vpack.c.bf16 %v5251_v24, %v5250_v42 }
 0x8ba   : > { %v3178_v38 = vpop.permute.xlu0 %3177 }
 0x8bc   : > { %4743 = vmatmul.mubr.msk.f32.vlgmr.msra.gmra.mrb[30].mxu0 %vm480_vm1, %v2907_v3 }
 0x8bd   : > { %4979 = vmatpush3.bf16.xpose.msk.msra.mxu0 %vm5910_vm2, %v4974_v19  ;;  %4756 = vmatprep.mubr.msk.f32.mxu0 %vm480_vm1, %v3087_v4 }
 0x8d8   : > { %v2536_v44 = vpop.xlane.xlu1 %2535 }
 0x8d9   : > { %5366 = vrcp.f32 %v2536_v44 }
 0x8dc   : > { %v2998_v26 = vpop.permute.xlu1 %2997 }
 0x8e0   : > { %v3089_v9 = vpop.permute.xlu1 %3088 }
 0x8e1   : > { %4757 = vmatmul.mubr.msk.f32.vlgmr.msra.gmra.mrb[32].mxu0 %vm480_vm1, %v3089_v9 }
 0x8e3   : > { %v5367_v41 = vpop.eup %5366 }
 0x8e4   : > { %v2554_v29 = vmul.f32 %v5367_v41, %v6362_v63  ;;  %v3180_v10 = vpop.permute.xlu1 %3179 }
 0x8e6   : > { %4735 = vmatprep.mubr.msk.f32.mxu1 %vm851_vm5, %v2554_v29 }
 0x8e7   : > { %4736 = vmatmul.mubr.msk.f32.vlgmr.msra.gmra.mrb[24].mxu1 %vm851_vm5, %v2555_v49 }
 0x8e8   : > { %4973 = vmatpush3.bf16.xpose.msk.msra.mxu1 %vm5910_vm2, %v4968_v13  ;;  %4749 = vmatprep.mubr.msk.f32.mxu1 %vm480_vm1, %v2996_v52 }
 0x8e9   : > { %4982 = vmatprep.subr.msk.bf16.mxu1 %vm5910_vm2, %v4980_v21 }
 0x8ef   : > { %4750 = vmatmul.mubr.msk.f32.vlgmr.msra.gmra.mrb[26].mxu1 %vm480_vm1, %v2998_v26 }
 0x8f0   : > { %4985 = vmatpush3.bf16.xpose.msk.msra.mxu1 %vm5910_vm2, %v4980_v21  ;;  %4763 = vmatprep.mubr.msk.f32.mxu1 %vm480_vm1, %v3178_v38 }
 0x8f7   : > { %4764 = vmatmul.mubr.msk.f32.vlgmr.msra.gmra.mrb[28].mxu1 %vm480_vm1, %v3180_v10 }
 0x94d   : > { %v6414_v63 = vpop.f32.mrb[26].mxu0 }
 0x94e   : > { %v6416_v40 = vpop.f32.mrb[27].mxu0 }
 0x983   : > { %v6418_v5 = vpop.f32.mrb[22].mxu1 }
 0x984   : > { %v6420_v43 = vpop.f32.mrb[23].mxu1 }
 0x987   : > { %v6422_v47 = vpop.f32.mrb[28].mxu0 }
 0x988   : > { %v6424_v48 = vpop.f32.mrb[29].mxu0 }
 0x98f   : > { %v4744_v50 = vpop.f32.mrb[30].mxu0 }
 0x990   : > { %v3269_v31 = vsel %vm5954_vm3, %v4744_v50, -1e+30  ;;  %v2986_v45 = vpop.f32.mrb[31].mxu0 }
 0x991   : > { %v3279_v7 = vsel %vm851_vm5, %v3269_v31, -inf  ;;  %v3268_v22 = vsel %vm5958_vm4, %v2986_v45, -1e+30 }
 0x992   : > { %v3276_v53 = vsel %vm851_vm5, %v3268_v22, -inf  ;;  %3280 = vmax.xlane.f32.xlu1 %v3279_v7 }
 0x993   : > { %3277 = vmax.xlane.f32.xlu0 %v3276_v53 }
 0x9b4   : > { %v4758_v51 = vpop.f32.mrb[32].mxu0 }
 0x9b5   : > { %v3168_v11 = vpop.f32.mrb[33].mxu0  ;;  %v3273_v28 = vsel %vm5954_vm3, %v4758_v51, -1e+30 }
 0x9b6   : > { %v3272_v2 = vsel %vm5958_vm4, %v3168_v11, -1e+30  ;;  %v3291_v4 = vsel %vm851_vm5, %v3273_v28, -inf }
 0x9b7   : > { %v3288_v17 = vsel %vm851_vm5, %v3272_v2, -inf }
 0x9b8   : > { %3289 = vmax.xlane.f32.xlu1 %v3288_v17 }
 0x9ba   : > { %v6435_v37 = vpop.f32.mrb[24].mxu1 }
 0x9bb   : > { %v6437_v25 = vpop.f32.mrb[25].mxu1 }
 0x9c2   : > { %v4751_v62 = vpop.f32.mrb[26].mxu1 }
 0x9c3   : > { %v3077_v6 = vpop.f32.mrb[27].mxu1  ;;  %v3271_v1 = vsel %vm5954_vm3, %v4751_v62, -1e+30 }
 0x9c4   : > { %v3270_v13 = vsel %vm5958_vm4, %v3077_v6, -1e+30  ;;  %v3285_v3 = vsel %vm851_vm5, %v3271_v1, -inf }
 0x9c5   : > { %v3282_v12 = vsel %vm851_vm5, %v3270_v13, -inf }
 0x9c6   : > { %3283 = vmax.xlane.f32.xlu0 %v3282_v12 }
 0x9ca   : > { %v4765_v46 = vpop.f32.mrb[28].mxu1  ;;  %3286 = vmax.xlane.f32.xlu0 %v3285_v3 }
 0x9cb   : > { %v3259_v19 = vpop.f32.mrb[29].mxu1  ;;  %v3275_v44 = vsel %vm5954_vm3, %v4765_v46, -1e+30 }
 0x9cc   : > { %v6449_v52 = vsel %vm5958_vm4, %v3259_v19, -1e+30  ;;  %v3297_v26 = vsel %vm851_vm5, %v3275_v44, -inf }
 0x9cd   : > { %v3294_v14 = vsel %vm851_vm5, %v6449_v52, -inf }
 0x9ce   : > { %3292 = vmax.xlane.f32.xlu0 %v3291_v4  ;;  %3295 = vmax.xlane.f32.xlu1 %v3294_v14 }
 0x9d2   : > { %3298 = vmax.xlane.f32.xlu0 %v3297_v26 }
 0x9df   : > { %5253 = vrot.lane.b32.xlu1 %v5888_v16, %s5606_s20 }
 0xa1f   : > { %v3281_v56 = vpop.xlane.xlu1 %3280 }
 0xa20   : > { %v3301_v9 = vsub.f32 %v3269_v31, %v3281_v56  ;;  %v3278_v18 = vpop.xlane.xlu0 %3277 }
 0xa21   : > { %v3300_v41 = vsub.f32 %v3268_v22, %v3278_v18 }
 0xa22   : > { %v3310_v24 = vmul.f32 1.442695, %v3301_v9 }
 0xa23   : > { %v3308_v42 = vmul.f32 1.442695, %v3300_v41 }
 0xa24   : > { %5368 = vpow2.f32 %v3310_v24 }
 0xa25   : > { %5370 = vpow2.f32 %v3308_v42 }
 0xa2e   : > { %v6459_v29 = vpop.eup %5368 }
 0xa2f   : > { %v6461_v55 = vpop.eup %5370  ;;  %v3327_v49 = vsel %vm851_vm5, %v6459_v29, 0.0 }
 0xa30   : > { %3328 = vadd.xlane.f32.xlu0 %v3327_v49  ;;  %v3324_v21 = vsel %vm851_vm5, %v6461_v55, 0.0 }
 0xa31   : > { %3325 = vadd.xlane.f32.xlu1 %v3324_v21 }
 0xa45   : > { %v3290_v16 = vpop.xlane.xlu1 %3289 }
 0xa46   : > { %v3304_v38 = vsub.f32 %v3272_v2, %v3290_v16 }
 0xa48   : > { %v3316_v31 = vmul.f32 1.442695, %v3304_v38 }
 0xa53   : > { %v3284_v10 = vpop.xlane.xlu0 %3283 }
 0xa54   : > { %v3302_v50 = vsub.f32 %v3270_v13, %v3284_v10 }
 0xa56   : > { %v3312_v45 = vmul.f32 1.442695, %v3302_v50 }
 0xa57   : > { %v3287_v7 = vpop.xlane.xlu0 %3286 }
 0xa58   : > { %5372 = vpow2.f32 %v3312_v45  ;;  %v3303_v22 = vsub.f32 %v3271_v1, %v3287_v7 }
 0xa59   : > { %5374 = vpow2.f32 %v3316_v31 }
 0xa5a   : > { %v3314_v53 = vmul.f32 1.442695, %v3303_v22 }
 0xa5b   : > { %v3293_v51 = vpop.xlane.xlu0 %3292  ;;  %v3296_v11 = vpop.xlane.xlu1 %3295 }
 0xa5c   : > { %5376 = vpow2.f32 %v3314_v53  ;;  %v3305_v17 = vsub.f32 %v3273_v28, %v3293_v51  ;;  %v3306_v24 = vsub.f32 %v6449_v52, %v3296_v11 }
 0xa5e   : > { %v3318_v62 = vmul.f32 1.442695, %v3305_v17  ;;  %v3320_v42 = vmul.f32 1.442695, %v3306_v24 }
 0xa5f   : > { %v3299_v6 = vpop.xlane.xlu0 %3298  ;;  %v5254_v12 = vpop.permute.xlu1 %5253 }
 0xa60   : > { %5378 = vpow2.f32 %v3318_v62  ;;  %v3307_v3 = vsub.f32 %v3275_v44, %v3299_v6  ;;  %v5256_v46 = vunpack.i.h.bf16 %v5254_v12  ;;  %v5255_v2 = vunpack.i.l.bf16 %v5254_v12 }
 0xa62   : > { %v6467_v19 = vpop.eup %5372  ;;  %v3322_v13 = vmul.f32 1.442695, %v3307_v3  ;;  %v4986_v4 = vpack.c.bf16 %v5256_v46, %v5255_v2 }
 0xa63   : > { %v3330_v1 = vsel %vm851_vm5, %v6467_v19, 0.0  ;;  %v6471_v14 = vpop.eup %5374 }
 0xa64   : > { %5380 = vpow2.f32 %v3322_v13  ;;  %3331 = vadd.xlane.f32.xlu1 %v3330_v1  ;;  %4987 = vmatprep.subr.bf16.mxu0 %v4986_v4  ;;  %v3336_v26 = vsel %vm851_vm5, %v6471_v14, 0.0 }
 0xa65   : > { %4989 = vmatpush3.bf16.msra.mxu0 %v4986_v4  ;;  %5382 = vpow2.f32 %v3320_v42 }
 0xa66   : > { %v6473_v28 = vpop.eup %5376 }
 0xa67   : > { %v3333_v44 = vsel %vm851_vm5, %v6473_v28, 0.0 }
 0xa68   : > { %3334 = vadd.xlane.f32.xlu0 %v3333_v44  ;;  %3337 = vadd.xlane.f32.xlu1 %v3336_v26 }
 0xa6a   : > { %v6479_v56 = vpop.eup %5378 }
 0xa6b   : > { %v3339_v9 = vsel %vm851_vm5, %v6479_v56, 0.0 }
 0xa6c   : > { %3340 = vadd.xlane.f32.xlu0 %v3339_v9 }
 0xa6e   : > { %v6483_v18 = vpop.eup %5380 }
 0xa6f   : > { %v3345_v41 = vsel %vm851_vm5, %v6483_v18, 0.0 }
 0xa70   : > { %3346 = vadd.xlane.f32.xlu0 %v3345_v41 }
 0xa79   : > { %5263 = vrot.lane.b32.xlu1 %v5898_v23, %s5606_s20  ;;  %v6498_v23 = vpop.eup %5382 }
 0xa86   : > { %5258 = vrot.lane.b32.xlu0 %v5895_v20, %s5606_s20  ;;  %v3342_v20 = vsel %vm851_vm5, %v6498_v23, 0.0 }
 0xa8a   : > { %3720 = vrot.lane.b32.xlu0 %v6260_v58, %s5607_s7 }
 0xa8e   : > { %3752 = vrot.lane.b32.xlu0 %v6416_v40, %s5608_s11 }
 0xa92   : > { %3724 = vrot.lane.b32.xlu0 %v6264_v60, %s5607_s7 }
 0xa96   : > { %3756 = vrot.lane.b32.xlu0 %v6420_v43, %s5608_s11 }
 0xa9a   : > { %3728 = vrot.lane.b32.xlu0 %v6268_v0, %s5607_s7 }
 0xa9d   : > { %3343 = vadd.xlane.f32.xlu1 %v3342_v20 }
 0xa9e   : > { %3760 = vrot.lane.b32.xlu0 %v6424_v48, %s5608_s11 }
 0xaa2   : > { %3732 = vrot.lane.b32.xlu0 %v6284_v8, %s5607_s7 }
 0xaa6   : > { %3764 = vrot.lane.b32.xlu0 %v6437_v25, %s5608_s11 }
 0xaae   : > { %5268 = vrot.lane.b32.xlu1 %v5905_v27, %s5606_s20  ;;  %s4122_s20 = scalar_lea.sflag [#allocation4], %s5852_s13 }
 0xab2   : > { %3722 = vrot.lane.b32.xlu1 %v6258_v36, %s5607_s7 }
 0xab6   : > { %3754 = vrot.lane.b32.xlu1 %v6414_v63, %s5608_s11 }
 0xaba   : > { %3726 = vrot.lane.b32.xlu1 %v6262_v59, %s5607_s7 }
 0xabd   : > { %v3329_v58 = vpop.xlane.xlu0 %3328 }
 0xabe   : > { %5384 = vrcp.f32 %v3329_v58  ;;  %3758 = vrot.lane.b32.xlu1 %v6418_v5, %s5608_s11  ;;  %v3326_v60 = vpop.xlane.xlu1 %3325 }
 0xabf   : > { %5386 = vrcp.f32 %v3326_v60  ;;  %v3833_v60 = vld [vmem:[#allocation7] sm:$0xff] }
 0xac2   : > { %3730 = vrot.lane.b32.xlu1 %v6266_v39, %s5607_s7 }
 0xac6   : > { %3762 = vrot.lane.b32.xlu1 %v6422_v47, %s5608_s11 }
 0xac8   : > { %v5385_v27 = vpop.eup %5384 }
 0xac9   : > { %v5387_v0 = vpop.eup %5386  ;;  %v3357_v59 = vmul.f32 %v5385_v27, %v6459_v29  ;;  %v3834_v27 = vld [vmem:[#allocation7 + $0x8] sm:$0xff] }
 0xaca   : > { %3734 = vrot.lane.b32.xlu1 %v6282_v61, %s5607_s7  ;;  %v3356_v36 = vmul.f32 %v5387_v0, %v6461_v55  ;;  %v3835_v0 = vld [vmem:[#allocation7 + $0x10] sm:$0xff] }
 0xacc   : > { %4770 = vmatprep.mubr.msk.f32.mxu0 %vm851_vm5, %v3356_v36  ;;  %v5002_v36 = vpack.c.bf16 %v3834_v27, %v3833_v60 }
 0xacd   : > { %4771 = vmatmul.mubr.msk.f32.vlgmr.msra.gmra.mrb[34].mxu0 %vm851_vm5, %v3357_v59 }
 0xace   : > { %3766 = vrot.lane.b32.xlu1 %v6435_v37, %s5608_s11  ;;  %s5514_s11 = scalar_lea.vmem %s6613_s8, 1024 }
 0xacf   : > { %p5515_p10 = scmp.ne.s32.totalorder %s6613_s8, %s5514_s11 }
 0xad1   : > { %p5516_p3 = pnand %p5515_p10, %p5801_p5 }
 0xad3   : > { %p5517_p7 = pneg %p5516_p3 }
 0xaf1   : > { %v3332_v8 = vpop.xlane.xlu1 %3331 }
 0xaf2   : > { %5388 = vrcp.f32 %v3332_v8 }
 0xaf5   : > { %v3335_v39 = vpop.xlane.xlu0 %3334  ;;  %v3338_v63 = vpop.xlane.xlu1 %3337 }
 0xaf6   : > { %5390 = vrcp.f32 %v3338_v63 }
 0xaf9   : > { %v3341_v40 = vpop.xlane.xlu0 %3340  ;;  %v5264_v5 = vpop.permute.xlu1 %5263 }
 0xafa   : > { %5392 = vrcp.f32 %v3341_v40  ;;  %v5266_v43 = vunpack.i.h.bf16 %v5264_v5  ;;  %v5265_v61 = vunpack.i.l.bf16 %v5264_v5  ;;  %v3973_v5 = vld [vmem:[#allocation8] sm:$0xff] }
 0xafb   : > { %5394 = vrcp.f32 %v3335_v39 }
 0xafc   : > { %v5389_v47 = vpop.eup %5388  ;;  %v4994_v48 = vpack.c.bf16 %v5266_v43, %v5265_v61  ;;  %v3974_v43 = vld [vmem:[#allocation8 + $0x8] sm:$0xff] }
 0xafd   : > { %v3347_v25 = vpop.xlane.xlu0 %3346  ;;  %v3358_v52 = vmul.f32 %v5389_v47, %v6467_v19  ;;  %v5010_v61 = vpack.c.bf16 %v3974_v43, %v3973_v5 }
 0xafe   : > { %4995 = vmatprep.subr.bf16.mxu0 %v4994_v48  ;;  %5396 = vrcp.f32 %v3347_v25 }
 0xaff   : > { %4777 = vmatprep.mubr.msk.f32.mxu1 %vm851_vm5, %v3358_v52  ;;  %4997 = vmatpush3.bf16.msra.mxu0 %v4994_v48 }
 0xb00   : > { %v5391_v37 = vpop.eup %5390  ;;  %5003 = vmatprep.subr.bf16.mxu0 %v5002_v36 }
 0xb01   : > { %v5259_v29 = vpop.permute.xlu0 %5258  ;;  %v3360_v21 = vmul.f32 %v5391_v37, %v6471_v14 }
 0xb02   : > { %v5261_v55 = vunpack.i.h.bf16 %v5259_v29  ;;  %v5260_v49 = vunpack.i.l.bf16 %v5259_v29 }
 0xb03   : > { %4784 = vmatprep.mubr.msk.f32.mxu0 %vm851_vm5, %v3360_v21 }
 0xb04   : > { %v5393_v16 = vpop.eup %5392  ;;  %v4990_v38 = vpack.c.bf16 %v5261_v55, %v5260_v49 }
 0xb05   : > { %v5395_v10 = vpop.eup %5394  ;;  %v3361_v50 = vmul.f32 %v5393_v16, %v6479_v56  ;;  %v6531_v31 = vpop.permute.xlu0 %3720 }
 0xb06   : > { %4991 = vmatprep.subr.bf16.mxu1 %v4990_v38  ;;  %v3359_v45 = vmul.f32 %v5395_v10, %v6473_v28  ;;  %v3808_v37 = vsel %vm480_vm1, %v6104_v32, %v6531_v31 }
 0xb07   : > { %4993 = vmatpush3.bf16.msra.mxu1 %v4990_v38  ;;  %4785 = vmatmul.mubr.msk.f32.vlgmr.msra.gmra.mrb[36].mxu0 %vm851_vm5, %v3361_v50 }
 0xb08   : > { %v5397_v14 = vpop.eup %5396  ;;  %5005 = vmatpush3.bf16.msra.mxu0 %v5002_v36 }
 0xb09   : > { %v6535_v7 = vpop.permute.xlu0 %3752  ;;  %v3363_v26 = vmul.f32 %v5397_v14, %v6483_v18 }
 0xb0a   : > { %4778 = vmatmul.mubr.msk.f32.vlgmr.msra.gmra.mrb[30].mxu1 %vm851_vm5, %v3359_v45  ;;  %v3816_v55 = vsel %vm851_vm5, %v3808_v37, %v6535_v7 }
 0xb0d   : > { %v3725_v22 = vpop.permute.xlu0 %3724 }
 0xb0e   : > { %v3810_v53 = vsel %vm480_vm1, %v6108_v34, %v3725_v22 }
 0xb11   : > { %v3757_v51 = vpop.permute.xlu0 %3756 }
 0xb12   : > { %v6541_v11 = vsel %vm851_vm5, %v3810_v53, %v3757_v51  ;;  %v3975_v51 = vld [vmem:[#allocation8 + $0x10] sm:$0xff] }
 0xb15   : > { %v3729_v17 = vpop.permute.xlu0 %3728 }
 0xb16   : > { %v3812_v62 = vsel %vm480_vm1, %v6112_v35, %v3729_v17  ;;  %v3976_v17 = vld [vmem:[#allocation8 + $0x18] sm:$0xff] }
 0xb19   : > { %v3761_v6 = vpop.permute.xlu0 %3760 }
 0xb1a   : > { %v6546_v12 = vsel %vm851_vm5, %v3812_v62, %v3761_v6 }
 0xb1d   : > { %v3733_v3 = vpop.permute.xlu0 %3732 }
 0xb1e   : > { %v6550_v46 = vsel %vm480_vm1, %v6128_v57, %v3733_v3 }
 0xb21   : > { %v3765_v52 = vpop.permute.xlu0 %3764 }
 0xb22   : > { %v3822_v6 = vsel %vm851_vm5, %v6550_v46, %v3765_v52 }
 0xb2a   : > { %v3344_v2 = vpop.xlane.xlu1 %3343 }
 0xb2b   : > { %5398 = vrcp.f32 %v3344_v2 }
 0xb2e   : > { %v5269_v34 = vpop.permute.xlu1 %5268 }
 0xb2f   : > { %v5271_v19 = vunpack.i.h.bf16 %v5269_v34  ;;  %v5270_v13 = vunpack.i.l.bf16 %v5269_v34 }
 0xb31   : > { %v4998_v4 = vpack.c.bf16 %v5271_v19, %v5270_v13  ;;  %v4358_v19 = vld [vmem:[%s6666_s3] ss:$0 sm:$0xff] }
 0xb32   : > { %v3723_v1 = vpop.permute.xlu1 %3722 }
 0xb33   : > { %4999 = vmatprep.subr.bf16.mxu1 %v4998_v4  ;;  %v3809_v49 = vsel %vm480_vm1, %v6102_v30, %v3723_v1 }
 0xb34   : > { %5001 = vmatpush3.bf16.msra.mxu1 %v4998_v4 }
 0xb35   : > { %v5399_v35 = vpop.eup %5398  ;;  %5011 = vmatprep.subr.bf16.mxu1 %v5010_v61 }
 0xb36   : > { %v3755_v28 = vpop.permute.xlu1 %3754  ;;  %v3362_v44 = vmul.f32 %v5399_v35, %v6498_v23 }
 0xb37   : > { %v3817_v16 = vsel %vm851_vm5, %v3809_v49, %v3755_v28 }
 0xb38   : > { %4791 = vmatprep.mubr.msk.f32.mxu1 %vm851_vm5, %v3362_v44 }
 0xb39   : > { %4792 = vmatmul.mubr.msk.f32.vlgmr.msra.gmra.mrb[32].mxu1 %vm851_vm5, %v3363_v26 }
 0xb3a   : > { %v3727_v57 = vpop.permute.xlu1 %3726  ;;  %5013 = vmatpush3.bf16.msra.mxu1 %v5010_v61 }
 0xb3b   : > { %v3811_v56 = vsel %vm480_vm1, %v6106_v33, %v3727_v57  ;;  %v3836_v33 = vld [vmem:[#allocation7 + $0x18] sm:$0xff] }
 0xb3c   : > { %v5006_v59 = vpack.c.bf16 %v3836_v33, %v3835_v0 }
 0xb3e   : > { %v3759_v9 = vpop.permute.xlu1 %3758  ;;  %5007 = vmatprep.subr.bf16.mxu0 %v5006_v59 }
 0xb3f   : > { %v3819_v41 = vsel %vm851_vm5, %v3811_v56, %v3759_v9  ;;  %5009 = vmatpush3.bf16.msra.mxu0 %v5006_v59 }
 0xb42   : > { %v3731_v24 = vpop.permute.xlu1 %3730 }
 0xb43   : > { %v3813_v42 = vsel %vm480_vm1, %v6110_v15, %v3731_v24 }
 0xb46   : > { %v3763_v20 = vpop.permute.xlu1 %3762 }
 0xb47   : > { %v3821_v23 = vsel %vm851_vm5, %v3813_v42, %v3763_v20 }
 0xb4a   : > { %v3735_v58 = vpop.permute.xlu1 %3734 }
 0xb4b   : > { %v6564_v18 = vsel %vm480_vm1, %v6126_v54, %v3735_v58 }
 0xb4e   : > { %v3767_v25 = vpop.permute.xlu1 %3766 }
 0xb4f   : > { %v3823_v2 = vsel %vm851_vm5, %v6564_v18, %v3767_v25 }
 0xba0   : > { %v4772_v8 = vpop.f32.mrb[34].mxu0 }
 0xba1   : > { %3786 = vrot.lane.b32.xlu1 %v4772_v8, %s5609_s27  ;;  %v3442_v15 = vpop.f32.mrb[35].mxu0 }
 0xba2   : > { %3784 = vrot.lane.b32.xlu0 %v3442_v15, %s5609_s27 }
 0xbda   : > { %v4786_v39 = vpop.f32.mrb[36].mxu0 }
 0xbdb   : > { %v3616_v63 = vpop.f32.mrb[37].mxu0 }
 0xbdd   : > { %v4779_v40 = vpop.f32.mrb[30].mxu1 }
 0xbde   : > { %v3529_v54 = vpop.f32.mrb[31].mxu1  ;;  %3790 = vrot.lane.b32.xlu1 %v4779_v40, %s5609_s27 }
 0xbdf   : > { %3788 = vrot.lane.b32.xlu0 %v3529_v54, %s5609_s27 }
 0xbe2   : > { %3794 = vrot.lane.b32.xlu1 %v4786_v39, %s5609_s27 }
 0xbe3   : > { %3792 = vrot.lane.b32.xlu0 %v3616_v63, %s5609_s27 }
 0xc0c   : > { %v4793_v47 = vpop.f32.mrb[32].mxu1 }
 0xc0d   : > { %v3703_v48 = vpop.f32.mrb[33].mxu1  ;;  %3798 = vrot.lane.b32.xlu1 %v4793_v47, %s5609_s27 }
 0xc0e   : > { %3796 = vrot.lane.b32.xlu0 %v3703_v48, %s5609_s27  ;;  %s5518_s27 = sshll.u32 %s5610_s25, 4  ;;  %s5519_s27 = int_to_ptr.vmem [resolvable:$false] %s5518_s27 }
 0xc0f   : > { %s5520_s29 = scalar_lea.vmem %s5519_s27, 2048  ;;  %p5521_p12 = scmp.lt.s32.totalorder %s6613_s8, %s5519_s27 }
 0xc10   : > { %p5522_p1 = scmp.lt.s32.totalorder %s5520_s29, %s5514_s11 }
 0xc12   : > { %p5523_p2 = por %p5522_p1, %p5521_p12 }
 0xc13   : > { %v3787_v29 = vpop.permute.xlu1 %3786 }
 0xc14   : > { %v3785_v21 = vpop.permute.xlu0 %3784  ;;  %v3826_v10 = vsel %vm3824_vm6, %v3817_v16, %v3787_v29  ;;  %p5524_p4 = pnand %p5523_p2, %p5517_p7 }
 0xc15   : > { %v3825_v38 = vsel %vm3824_vm6, %v3816_v55, %v3785_v21 }
 0xc16   : > { %4802 = vmatprep.mubr.msk.f32.mxu0 %vm329_vm0, %v3825_v38 }
 0xc17   : > { %4803 = vmatmul.mubr.msk.f32.vlgmr.msra.gmra.mrb[38].mxu0 %vm329_vm0, %v3826_v10 }
 0xc50   : > { %v3791_v50 = vpop.permute.xlu1 %3790 }
 0xc51   : > { %v3789_v32 = vpop.permute.xlu0 %3788  ;;  %v3828_v45 = vsel %vm3824_vm6, %v3819_v41, %v3791_v50 }
 0xc52   : > { %v3827_v31 = vsel %vm3824_vm6, %v6541_v11, %v3789_v32  ;;  %v5014_v11 = vpack.c.bf16 %v3976_v17, %v3975_v51 }
 0xc53   : > { %4805 = vmatprep.mubr.msk.f32.mxu0 %vm329_vm0, %v3827_v31 }
 0xc54   : > { %4806 = vmatmul.mubr.msk.f32.gmra.mrb[40].mxu0 %vm329_vm0, %v3828_v45  ;;  %v3795_v30 = vpop.permute.xlu1 %3794  ;;  %5015 = vmatprep.subr.bf16.mxu1 %v5014_v11 }
 0xc55   : > { %v3793_v7 = vpop.permute.xlu0 %3792  ;;  %v3830_v53 = vsel %vm3824_vm6, %v3821_v23, %v3795_v30  ;;  %5017 = vmatpush3.bf16.msra.mxu1 %v5014_v11  ;;  %v4367_v23 = vld [vmem:[%s6668_s5] ss:$0 sm:$0xff] }
 0xc56   : > { %v3829_v22 = vsel %vm3824_vm6, %v6546_v12, %v3793_v7 }
 0xc57   : > { %4808 = vmatprep.mubr.msk.f32.mxu0 %vm329_vm0, %v3829_v22 }
 0xc58   : > { %4809 = vmatmul.mubr.msk.f32.gmra.mrb[42].mxu0 %vm329_vm0, %v3830_v53 }
 0xc7f   : > { %v3799_v62 = vpop.permute.xlu1 %3798 }
 0xc80   : > { %v3797_v3 = vpop.permute.xlu0 %3796  ;;  %v3832_v34 = vsel %vm3824_vm6, %v3823_v2, %v3799_v62 }
 0xc81   : > { %v3831_v12 = vsel %vm3824_vm6, %v3822_v6, %v3797_v3 }
 0xc82   : > { %4811 = vmatprep.mubr.msk.f32.mxu0 %vm329_vm0, %v3831_v12 }
 0xc83   : > { %4812 = vmatmul.mubr.msk.f32.gmra.mrb[44].mxu0 %vm329_vm0, %v3832_v34 }
 0xcea   : > { %v4804_v13 = vpop.f32.mrb[38].mxu0 }
 0xceb   : > { %v3934_v4 = vpop.f32.mrb[39].mxu0  ;;  %v3940_v46 = vadd.f32 %v4804_v13, %v4358_v19 }
 0xcec   : > { %v3935_v1 = vadd.f32 %v4358_v19, %v3934_v4 }
 0xcee   : > { %4822 = vmatprep.mubr.msk.f32.mxu1 %vm329_vm0, %v3935_v1 }
 0xcef   : > { %4823 = vmatmul.mubr.msk.f32.vlgmr.msra.gmra.mrb[34].mxu1 %vm329_vm0, %v3940_v46 }
 0xd27   : > { %v4807_v14 = vpop.f32.mrb[40].mxu0 }
 0xd28   : > { %v3944_v35 = vpop.f32.mrb[41].mxu0  ;;  %v3950_v44 = vadd.f32 %v4807_v14, %v4358_v19 }
 0xd29   : > { %v3945_v28 = vadd.f32 %v4358_v19, %v3944_v35 }
 0xd2b   : > { %v4810_v26 = vpop.f32.mrb[42].mxu0  ;;  %4825 = vmatprep.mubr.msk.f32.mxu1 %vm329_vm0, %v3945_v28 }
 0xd2c   : > { %v3954_v57 = vpop.f32.mrb[43].mxu0  ;;  %4826 = vmatmul.mubr.msk.f32.gmra.mrb[36].mxu1 %vm329_vm0, %v3950_v44  ;;  %v3960_v9 = vadd.f32 %v4810_v26, %v4358_v19 }
 0xd2d   : > { %v3955_v56 = vadd.f32 %v4358_v19, %v3954_v57 }
 0xd2f   : > { %4828 = vmatprep.mubr.msk.f32.mxu1 %vm329_vm0, %v3955_v56 }
 0xd30   : > { %4829 = vmatmul.mubr.msk.f32.gmra.mrb[38].mxu1 %vm329_vm0, %v3960_v9 }
 0xd56   : > { %v4813_v41 = vpop.f32.mrb[44].mxu0 }
 0xd57   : > { %v3964_v24 = vpop.f32.mrb[45].mxu0  ;;  %v3970_v20 = vadd.f32 %v4813_v41, %v4358_v19 }
 0xd58   : > { %v3965_v42 = vadd.f32 %v4358_v19, %v3964_v24 }
 0xd5a   : > { %4831 = vmatprep.mubr.msk.f32.mxu1 %vm329_vm0, %v3965_v42 }
 0xd5b   : > { %4832 = vmatmul.mubr.msk.f32.gmra.mrb[40].mxu1 %vm329_vm0, %v3970_v20 }
 0xdc2   : > { %v4824_v58 = vpop.f32.mrb[34].mxu1 }
 0xdc3   : > { %v4080_v18 = vadd.f32 %v4824_v58, %v4367_v23  ;;  %v4074_v60 = vpop.f32.mrb[35].mxu1 }
 0xdc4   : > { %v4075_v27 = vadd.f32 %v4367_v23, %v4074_v60 }
 0xdc5   : > { %4114 = vst [vmem:[%s314_s10 + $0x8] sm:$0xff] %v4080_v18 }
 0xdc6   : > { %4113 = vst [vmem:[%s314_s10] sm:$0xff] %v4075_v27 }
 0xdff   : > { %v4827_v0 = vpop.f32.mrb[36].mxu1 }
 0xe00   : > { %v4090_v36 = vadd.f32 %v4827_v0, %v4367_v23  ;;  %v4084_v33 = vpop.f32.mrb[37].mxu1 }
 0xe01   : > { %v4085_v59 = vadd.f32 %v4367_v23, %v4084_v33 }
 0xe02   : > { %4116 = vst [vmem:[%s314_s10 + $0x18] sm:$0xff] %v4090_v36 }
 0xe03   : > { %4115 = vst [vmem:[%s314_s10 + $0x10] sm:$0xff] %v4085_v59  ;;  %v4830_v8 = vpop.f32.mrb[38].mxu1 }
 0xe04   : > { %v4100_v15 = vadd.f32 %v4830_v8, %v4367_v23  ;;  %v4094_v39 = vpop.f32.mrb[39].mxu1 }
 0xe05   : > { %v4095_v63 = vadd.f32 %v4367_v23, %v4094_v39 }
 0xe06   : > { %4118 = vst [vmem:[%s314_s10 + $0x28] sm:$0xff] %v4100_v15 }
 0xe07   : > { %4117 = vst [vmem:[%s314_s10 + $0x20] sm:$0xff] %v4095_v63 }
 0xe2e   : > { %v4833_v40 = vpop.f32.mrb[40].mxu1 }
 0xe2f   : > { %v4110_v54 = vadd.f32 %v4833_v40, %v4367_v23  ;;  %v4104_v5 = vpop.f32.mrb[41].mxu1 }
 0xe30   : > { %v4105_v43 = vadd.f32 %v4367_v23, %v4104_v5 }
 0xe31   : > { %4120 = vst [vmem:[%s314_s10 + $0x38] sm:$0xff] %v4110_v54 }
 0xe32   : > { %4119 = vst [vmem:[%s314_s10 + $0x30] sm:$0xff] %v4105_v43 }
 0xe33   : > { %5527 = shalt.err (!%p5524_p4)
}
 0xe34   : > { %s5528_s30 = scalar_lea.hbm %s6618_s12, 1024  ;;  %s5532_s10 = scalar_lea.hbm %s6669_s6, 2048 }
 0xe35   : > { %p5529_p9 = scmp.ne.s32.totalorder %s6618_s12, %s5528_s30  ;;  %p5533_p8 = scmp.lt.u32.totalorder %s6618_s12, %s6669_s6 }
 0xe36   : > { %p5534_p13 = scmp.lt.u32.totalorder %s5532_s10, %s5528_s30  ;;  %p5536_p10 = scmp.lt.u32.totalorder %s5528_s30, %s6618_s12 }
 0xe37   : > { %p5530_p0 = pnand %p5529_p9, %p5801_p5 }
 0xe38   : > { %p5535_p6 = por %p5534_p13, %p5533_p8 }
 0xe39   : > { %p5531_p11 = pneg %p5530_p0 }
 0xe3a   : > { %p5537_p3 = por %p5536_p10, %p5535_p6 }
 0xe3c   : > { %p5538_p7 = pnand %p5537_p3, %p5531_p11 }
 0xe3e   : > { %5541 = shalt.err (!%p5538_p7)
}
 0xe3f   : > { %s5611_s17 = smov 128  }
 0xe40   : > { %5032 = dma.vmem_to_hbm [thread:$0]  (%p5801_p5), %s6613_s8, 1024, %s6618_s12, %s4122_s20, %s5611_s17, %s5611_s17, %s5607_s7  }
 0xe41 PF: > { %s4151_s11 = sand.u32 1, %s5576_s21   ;;  %p6693_p12 = scmp.ne.s32.totalorder %s6674_s28, 0 }
 0xe42   : > { %p6694_p1 = scmp.ge.s32.totalorder %s5588_s24, 2  ;;  %s4152_s25 = scalar_lea.sflag [#allocation4], %s4151_s11 }
 0xe44   : > { %p5049_p2 = pnand %p6694_p1, %p6693_p12 }
 0xe46   : > { %5571 = dma.done.wait (!%p5049_p2), %s4152_s25, 1024  }
 0xe47   : > { %5573 = vsyncadd (!%p5049_p2), %s4152_s25, 4294966272  ;;  %p21_p4 = scmp.ge.s32.totalorder %s5787_s18, 4   ;;  %s6695_s21 = smov %s5580_s22 }
 0xe48   : > { %s6696_s22 = smov %s5584_s23  ;;  %s6697_s23 = smov %s5797_s14 }
 0xe49   : > { %s6698_s24 = smov %s5787_s18  ;;  %23 = sbr.rel (!%p21_p4) target bundleno = 7 (0x7), region = 101 }
 0xe50   :  { %4157 = vsyncpa [#allocation3], 1 }
 0xe51   :  { %4159 = vsyncpa [#allocation3 + $0x1], 1 }
 0xe52   :  { %4160 = vsyncpa [#allocation6], 1 }
 0xe53   :  { %4161 = vsyncpa [#allocation9], 1 }
 0xe54   :  { %4162 = vsyncpa [#allocation4], 1 }
 0xe55   :  { %4164 = vsyncpa [#allocation4 + $0x1], 1 }

</bundles_post_ra>
